<compile_context>
chip_gen: v7x
topology: tpu7x:2x2x1
jax: 0.10.0
libtpu: 0.0.40
codegen_flags: <defaults>
</compile_context>

<pallas_src>
import jax
import jax.numpy as jnp
from jax import lax
from jax.experimental import pallas as pl
from jax.experimental.pallas import tpu as pltpu

N_EMBD = 32
BLOCK_SIZE = 8          # sequence length T
N_HEADS = 1             # reference's double projection only type-checks for n_heads == 1
N_LAYERS = 2
N_VOCAB = N_EMBD        # reference's logits-add / final LN only type-check for n_vocab == n_embd
BATCH = 2
LN_EPS = 1e-5           # PyTorch LayerNorm default


# --------------------------- fused Pallas kernel ----------------------------
def _transformer_kernel(tok_ref, emb_tbl_ref,
                        kqv_w_ref, kqv_b_ref, proj_w_ref,
                        ffn_w1_ref, ffn_b1_ref, ffn_w2_ref,
                        cvecs_ref, head_w_ref, head_vecs_ref,
                        o_ref):
    C = N_EMBD
    T = BLOCK_SIZE
    R = tok_ref.shape[0]            # bb * T rows handled by this grid step
    V = emb_tbl_ref.shape[0]

    def layer_norm(y, g, b):
        # biased variance, like PyTorch LayerNorm; rsqrt goes to the EUP slot
        m = jnp.mean(y, axis=-1, keepdims=True)
        c = y - m
        v = jnp.mean(c * c, axis=-1, keepdims=True)
        return c * lax.rsqrt(v + LN_EPS) * g + b

    # ---- fused embedding gather: exact one-hot matmul on the MXU
    tok = tok_ref[...]                                                   # (R, 1) int32
    onehot = (tok == lax.broadcasted_iota(jnp.int32, (R, V), 1)).astype(jnp.float32)
    emb = jnp.dot(onehot, emb_tbl_ref[...], preferred_element_type=jnp.float32)  # (R, C)
    x = emb

    # ---- block-diagonal causal mask: bb independent causal sequences of length T
    row = lax.broadcasted_iota(jnp.int32, (R, R), 0)
    col = lax.broadcasted_iota(jnp.int32, (R, R), 1)
    if T & (T - 1) == 0:            # T is a power of two: shifts/ands, guaranteed lowering
        sh = T.bit_length() - 1
        same_seq = (row >> sh) == (col >> sh)
        causal = (row & (T - 1)) >= (col & (T - 1))
    else:
        same_seq = (row // T) == (col // T)
        causal = (row % T) >= (col % T)
    mask = same_seq & causal
    NEG = jnp.float32(-1e30)        # finite: masked entries can never turn into NaN

    for l in range(N_LAYERS):       # static unroll; all weights VMEM-resident
        cv = cvecs_ref[l]           # (6, C): [proj_b_eff, ln1_g, ln1_b, ffn_b2, ln2_g, ln2_b]

        # ---- single-head self-attention (fused KQV, unscaled scores as in the reference)
        kqv = jnp.dot(x, kqv_w_ref[l], preferred_element_type=jnp.float32) + kqv_b_ref[l]
        k = kqv[:, 0 * C:1 * C]
        q = kqv[:, 1 * C:2 * C]
        v = kqv[:, 2 * C:3 * C]
        s = lax.dot_general(q, k, (((1,), (1,)), ((), ())),
                            preferred_element_type=jnp.float32)          # (R, R), no 1/sqrt(d)
        s = jnp.where(mask, s, NEG)                                      # causal + cross-batch mask
        s = s - jnp.max(s, axis=-1, keepdims=True)
        p = jnp.exp(s)
        inv = pl.reciprocal(jnp.sum(p, axis=-1, keepdims=True), approx=True)   # EUP slot
        attn = jnp.dot(p, v, preferred_element_type=jnp.float32) * inv   # scale after PV matmul
        # folded double projection (W_eff / b_eff computed host-side)
        attn = jnp.dot(attn, proj_w_ref[l], preferred_element_type=jnp.float32) + cv[0:1]
        x = layer_norm(attn + x, cv[1:2], cv[2:3])                       # (attn + x) -> LN

        # ---- feed-forward: Linear(C,4C) -> ReLU -> Linear(4C,C), fused add + LN
        h = jnp.dot(x, ffn_w1_ref[l], preferred_element_type=jnp.float32) + ffn_b1_ref[l]
        h = jnp.maximum(h, 0.0)
        f = jnp.dot(h, ffn_w2_ref[l], preferred_element_type=jnp.float32) + cv[3:4]
        x = layer_norm(f + x, cv[4:5], cv[5:6])                          # (ff + attn) -> LN

    # ---- fused head: [x | emb] @ [lin_in_w ; lin_out_w] + (lin_in_b + lin_out_b), final LN
    xe = jnp.concatenate([x, emb], axis=-1)                              # (R, 2C)
    logits = jnp.dot(xe, head_w_ref[...], preferred_element_type=jnp.float32) + head_vecs_ref[0:1]
    o_ref[...] = layer_norm(logits, head_vecs_ref[1:2], head_vecs_ref[2:3])


def _rows_per_step(total_rows):
    # v7x has 2 TensorCores per chip: keep two 'parallel' grid steps alive.
    # v5e/v6e are single-TC: collapse to one grid step (no per-step overhead).
    kind = ""
    try:
        kind = jax.devices()[0].device_kind.lower()
    except Exception:
        pass
    if "v7" in kind and total_rows > BLOCK_SIZE and total_rows % (2 * BLOCK_SIZE) == 0:
        return total_rows // 2
    return total_rows


def transformer_fused(tokens2d, packed, rows_per_step):
    BT = tokens2d.shape[0]
    C, V, L, H = N_EMBD, N_VOCAB, N_LAYERS, 4 * N_EMBD
    R = rows_per_step
    n_steps = BT // R

    def full(shape):
        nd = len(shape)
        return pl.BlockSpec(shape, lambda i, _nd=nd: (0,) * _nd)

    return pl.pallas_call(
        _transformer_kernel,
        out_shape=jax.ShapeDtypeStruct((BT, V), jnp.float32),
        grid=(n_steps,),
        in_specs=[
            pl.BlockSpec((R, 1), lambda i: (i, 0)),        # token ids (int32)
            full((V, C)),                                  # embedding table (VMEM-resident)
            full((L, C, 3 * C)), full((L, 1, 3 * C)),      # fused KQV weight / bias
            full((L, C, C)),                               # folded double projection
            full((L, C, H)), full((L, 1, H)),              # FFN up weight / bias
            full((L, H, C)),                               # FFN down weight
            full((L, 6, C)),                               # per-layer bias + LN slab
            full((2 * C, V)), full((3, V)),                # fused head weight + [bias, ln_g, ln_b]
        ],
        out_specs=pl.BlockSpec((R, V), lambda i: (i, 0)),
        compiler_params=pltpu.CompilerParams(
            dimension_semantics=("parallel",)),
    )(tokens2d, packed["embedding"],
      packed["kqv_w"], packed["kqv_b"], packed["proj_w"],
      packed["ffn_w1"], packed["ffn_b1"], packed["ffn_w2"],
      packed["cvecs"], packed["head_w"], packed["head_vecs"])


def transformer_forward(tokens, packed):
    B, T = tokens.shape
    tokens2d = tokens.reshape(B * T, 1).astype(jnp.int32)
    logits2d = transformer_fused(tokens2d, packed, _rows_per_step(B * T))
    logits = logits2d.reshape(B, T, N_VOCAB)
    # TODO(synk): the reference unconditionally unpacks `batch, time, channel = inputs.shape`
    # from 2-D token ids (always raises) and computes F.cross_entropy when labels are given;
    # only the labels=None logits path is implemented here.
    return logits, None


# --------------------------- host-side weight packing -----------------------
def pack_params(params):
    hp = lax.Precision.HIGHEST
    kqv_w, kqv_b, proj_w = [], [], []
    w1, b1, w2 = [], [], []
    cvecs = []
    for p in params["blocks"]:
        (wk, bk, wq, bq, wv, bv) = p["attn"]["heads"][0]                 # N_HEADS == 1
        kqv_w.append(jnp.concatenate([wk.T, wq.T, wv.T], axis=1))        # (C, 3C)
        kqv_b.append(jnp.concatenate([bk, bq, bv])[None, :])             # (1, 3C)
        wp_t = p["attn"]["proj_w"].T                                     # (C, C)
        proj_w.append(jnp.matmul(wp_t, wp_t, precision=hp))              # fold double projection
        proj_b_eff = jnp.matmul(p["attn"]["proj_b"], wp_t, precision=hp) + p["attn"]["proj_b"]
        w1.append(p["ffn_w1"].T); b1.append(p["ffn_b1"][None, :])
        w2.append(p["ffn_w2"].T)
        cvecs.append(jnp.stack([proj_b_eff,
                                p["attn_norm_g"], p["attn_norm_b"],
                                p["ffn_b2"],
                                p["ffn_norm_g"], p["ffn_norm_b"]], axis=0))  # (6, C)
    # fused output head (works because n_vocab == n_embd, as required by the reference)
    head_w = jnp.concatenate([params["lin_in_w"].T, params["lin_out_w"].T], axis=0)   # (2C, V)
    head_vecs = jnp.stack([params["lin_in_b"] + params["lin_out_b"],
                           params["norm_g"], params["norm_b"]], axis=0)                # (3, V)
    return {
        "embedding": params["embedding"],
        "kqv_w": jnp.stack(kqv_w), "kqv_b": jnp.stack(kqv_b),
        "proj_w": jnp.stack(proj_w),
        "ffn_w1": jnp.stack(w1), "ffn_b1": jnp.stack(b1),
        "ffn_w2": jnp.stack(w2),
        "cvecs": jnp.stack(cvecs),
        "head_w": head_w, "head_vecs": head_vecs,
    }


# --------------------------- deterministic params ---------------------------
def init_params(key):
    def dense(k, out_f, in_f, scale=0.1):
        kw, kb = jax.random.split(k)
        return (scale * jax.random.normal(kw, (out_f, in_f), jnp.float32),
                scale * jax.random.normal(kb, (out_f,), jnp.float32))

    keys = iter(jax.random.split(key, 256))
    params = {
        "embedding": jax.random.normal(next(keys), (N_VOCAB, N_EMBD), jnp.float32),
        "blocks": [],
        "norm_g": jnp.ones((N_EMBD,), jnp.float32),
        "norm_b": jnp.zeros((N_EMBD,), jnp.float32),
    }
    params["lin_in_w"], params["lin_in_b"] = dense(next(keys), N_VOCAB, N_EMBD)
    params["lin_out_w"], params["lin_out_b"] = dense(next(keys), N_EMBD, N_VOCAB)
    for _ in range(N_LAYERS):
        heads = []
        for _ in range(N_HEADS):
            wk, bk = dense(next(keys), N_EMBD, N_EMBD)
            wq, bq = dense(next(keys), N_EMBD, N_EMBD)
            wv, bv = dense(next(keys), N_EMBD, N_EMBD)
            heads.append((wk, bk, wq, bq, wv, bv))
        proj_w, proj_b = dense(next(keys), N_EMBD, N_HEADS * N_EMBD)
        ffn_w1, ffn_b1 = dense(next(keys), 4 * N_EMBD, N_EMBD)
        ffn_w2, ffn_b2 = dense(next(keys), N_EMBD, 4 * N_EMBD)
        params["blocks"].append({
            "attn": {"heads": heads, "proj_w": proj_w, "proj_b": proj_b},
            "attn_norm_g": jnp.ones((N_EMBD,), jnp.float32),
            "attn_norm_b": jnp.zeros((N_EMBD,), jnp.float32),
            "ffn_w1": ffn_w1, "ffn_b1": ffn_b1,
            "ffn_w2": ffn_w2, "ffn_b2": ffn_b2,
            "ffn_norm_g": jnp.ones((N_EMBD,), jnp.float32),
            "ffn_norm_b": jnp.zeros((N_EMBD,), jnp.float32),
        })
    return params


# --------------------------- pure-JAX reference (sanity check) --------------
def reference_forward(tokens, params):
    hp = lax.Precision.HIGHEST

    def lin(x, w, b):
        return jnp.einsum("btk,nk->btn", x, w, precision=hp) + b

    def ln(x, g, b):
        m = x.mean(-1, keepdims=True)
        v = ((x - m) ** 2).mean(-1, keepdims=True)
        return (x - m) / jnp.sqrt(v + LN_EPS) * g + b

    emb = params["embedding"][tokens]
    x = emb
    T = x.shape[1]
    mask = jnp.tril(jnp.ones((T, T), bool))
    for p in params["blocks"]:
        heads = []
        for (wk, bk, wq, bq, wv, bv) in p["attn"]["heads"]:
            k = lin(x, wk, bk); q = lin(x, wq, bq); v = lin(x, wv, bv)
            s = jnp.einsum("btd,bsd->bts", q, k, precision=hp)
            s = jnp.where(mask, s, -jnp.inf)
            pr = jax.nn.softmax(s, axis=-1)
            heads.append(jnp.einsum("bts,bsd->btd", pr, v, precision=hp))
        cat = jnp.concatenate(heads, axis=-1)
        a = lin(cat, p["attn"]["proj_w"], p["attn"]["proj_b"])
        a = lin(a, p["attn"]["proj_w"], p["attn"]["proj_b"])      # reference applies proj twice
        a = ln(a + x, p["attn_norm_g"], p["attn_norm_b"])
        h = jnp.maximum(lin(a, p["ffn_w1"], p["ffn_b1"]), 0.0)
        f = lin(h, p["ffn_w2"], p["ffn_b2"])
        x = ln(f + a, p["ffn_norm_g"], p["ffn_norm_b"])
    logits = lin(x, params["lin_in_w"], params["lin_in_b"])
    logits = logits + lin(emb, params["lin_out_w"], params["lin_out_b"])
    return ln(logits, params["norm_g"], params["norm_b"])


if __name__ == "__main__":
    key = jax.random.PRNGKey(0)
    k_params, k_tok = jax.random.split(key)
    params = init_params(k_params)
    tokens = jax.random.randint(k_tok, (BATCH, BLOCK_SIZE), 0, N_VOCAB, dtype=jnp.int32)

    packed = pack_params(params)                     # one-time host-side packing
    logits, loss = jax.jit(transformer_forward)(tokens, packed)
    logits = jax.block_until_ready(logits)
    assert logits.shape == (BATCH, BLOCK_SIZE, N_VOCAB)
    assert loss is None

    ref = reference_forward(tokens, params)
    err = float(jnp.max(jnp.abs(logits - ref)))
    assert err < 5e-3, f"max abs error vs reference: {err}"
    print("KERNEL_OK")
</pallas_src>

<mosaic_0001>
module attributes {stable_mosaic.version = 11 : i64} {
  func.func @_transformer_kernel(%arg0: i32, %arg1: memref<16x1xi32, #tpu.memory_space<vmem>>, %arg2: memref<32x32xf32, #tpu.memory_space<vmem>>, %arg3: memref<2x32x96xf32, #tpu.memory_space<vmem>>, %arg4: memref<2x1x96xf32, #tpu.memory_space<vmem>>, %arg5: memref<2x32x32xf32, #tpu.memory_space<vmem>>, %arg6: memref<2x32x128xf32, #tpu.memory_space<vmem>>, %arg7: memref<2x1x128xf32, #tpu.memory_space<vmem>>, %arg8: memref<2x128x32xf32, #tpu.memory_space<vmem>>, %arg9: memref<2x6x32xf32, #tpu.memory_space<vmem>>, %arg10: memref<64x32xf32, #tpu.memory_space<vmem>>, %arg11: memref<3x32xf32, #tpu.memory_space<vmem>>, %arg12: memref<16x32xf32, #tpu.memory_space<vmem>>) attributes {dimension_semantics = [#tpu.dimension_semantics<parallel>], iteration_bounds = array<i64: 1>, scalar_prefetch = 0 : i64, scratch_operands = 0 : i64, tpu.core_type = #tpu.core_type<tc>, window_params = [{transform_indices = @transform_0, window_bounds = array<i64: 16, 1>}, {pipeline_mode = #tpu.pipeline_mode<synchronous>, transform_indices = @transform_1, window_bounds = array<i64: 32, 32>}, {pipeline_mode = #tpu.pipeline_mode<synchronous>, transform_indices = @transform_2, window_bounds = array<i64: 2, 32, 96>}, {pipeline_mode = #tpu.pipeline_mode<synchronous>, transform_indices = @transform_3, window_bounds = array<i64: 2, 1, 96>}, {pipeline_mode = #tpu.pipeline_mode<synchronous>, transform_indices = @transform_4, window_bounds = array<i64: 2, 32, 32>}, {pipeline_mode = #tpu.pipeline_mode<synchronous>, transform_indices = @transform_5, window_bounds = array<i64: 2, 32, 128>}, {pipeline_mode = #tpu.pipeline_mode<synchronous>, transform_indices = @transform_6, window_bounds = array<i64: 2, 1, 128>}, {pipeline_mode = #tpu.pipeline_mode<synchronous>, transform_indices = @transform_7, window_bounds = array<i64: 2, 128, 32>}, {pipeline_mode = #tpu.pipeline_mode<synchronous>, transform_indices = @transform_8, window_bounds = array<i64: 2, 6, 32>}, {pipeline_mode = #tpu.pipeline_mode<synchronous>, transform_indices = @transform_9, window_bounds = array<i64: 64, 32>}, {pipeline_mode = #tpu.pipeline_mode<synchronous>, transform_indices = @transform_10, window_bounds = array<i64: 3, 32>}, {transform_indices = @transform_11, window_bounds = array<i64: 16, 32>}]} {
    %c0 = arith.constant 0 : index
    %c0_0 = arith.constant 0 : index
    %0 = vector.load %arg1[%c0, %c0_0] : memref<16x1xi32, #tpu.memory_space<vmem>>, vector<16x1xi32>
    %1 = tpu.iota {dimensions = array<i32: 1>} : vector<16x32xi32>
    %2 = vector.broadcast %0 : vector<16x1xi32> to vector<16x32xi32>
    %3 = arith.cmpi eq, %2, %1 : vector<16x32xi32>
    %4 = arith.extui %3 : vector<16x32xi1> to vector<16x32xi32>
    %5 = arith.sitofp %4 : vector<16x32xi32> to vector<16x32xf32>
    %c0_1 = arith.constant 0 : index
    %c0_2 = arith.constant 0 : index
    %6 = vector.load %arg2[%c0_1, %c0_2] : memref<32x32xf32, #tpu.memory_space<vmem>>, vector<32x32xf32>
    %cst = arith.constant dense<0.000000e+00> : vector<16x32xf32>
    %7 = tpu.matmul %5, %6, %cst {dimension_numbers = #tpu.dot_dimension_numbers<[1], [0], [0], [1], [0, 0, 1, 1], [], []>} : vector<16x32xf32>, vector<32x32xf32>, vector<16x32xf32> -> vector<16x32xf32>
    %8 = tpu.iota {dimensions = array<i32: 0>} : vector<16x16xi32>
    %9 = tpu.iota {dimensions = array<i32: 1>} : vector<16x16xi32>
    %c3_i32 = arith.constant 3 : i32
    %10 = vector.broadcast %c3_i32 : i32 to vector<16x16xi32>
    %11 = arith.shrsi %8, %10 : vector<16x16xi32>
    %c3_i32_3 = arith.constant 3 : i32
    %12 = vector.broadcast %c3_i32_3 : i32 to vector<16x16xi32>
    %13 = arith.shrsi %9, %12 : vector<16x16xi32>
    %14 = arith.cmpi eq, %11, %13 : vector<16x16xi32>
    %c7_i32 = arith.constant 7 : i32
    %15 = vector.broadcast %c7_i32 : i32 to vector<16x16xi32>
    %16 = arith.andi %8, %15 : vector<16x16xi32>
    %c7_i32_4 = arith.constant 7 : i32
    %17 = vector.broadcast %c7_i32_4 : i32 to vector<16x16xi32>
    %18 = arith.andi %9, %17 : vector<16x16xi32>
    %19 = arith.cmpi sge, %16, %18 : vector<16x16xi32>
    %20 = arith.andi %14, %19 : vector<16x16xi1>
    %c0_5 = arith.constant 0 : index
    %c0_6 = arith.constant 0 : index
    %c0_7 = arith.constant 0 : index
    %21 = vector.load %arg9[%c0_5, %c0_6, %c0_7] : memref<2x6x32xf32, #tpu.memory_space<vmem>>, vector<1x6x32xf32>
    %22 = vector.shape_cast %21 : vector<1x6x32xf32> to vector<6x32xf32>
    %c0_8 = arith.constant 0 : index
    %c0_9 = arith.constant 0 : index
    %c0_10 = arith.constant 0 : index
    %23 = vector.load %arg3[%c0_8, %c0_9, %c0_10] : memref<2x32x96xf32, #tpu.memory_space<vmem>>, vector<1x32x96xf32>
    %24 = vector.shape_cast %23 : vector<1x32x96xf32> to vector<32x96xf32>
    %cst_11 = arith.constant dense<0.000000e+00> : vector<16x96xf32>
    %25 = tpu.matmul %7, %24, %cst_11 {dimension_numbers = #tpu.dot_dimension_numbers<[1], [0], [0], [1], [0, 0, 1, 1], [], []>} : vector<16x32xf32>, vector<32x96xf32>, vector<16x96xf32> -> vector<16x96xf32>
    %c0_12 = arith.constant 0 : index
    %c0_13 = arith.constant 0 : index
    %c0_14 = arith.constant 0 : index
    %26 = vector.load %arg4[%c0_12, %c0_13, %c0_14] : memref<2x1x96xf32, #tpu.memory_space<vmem>>, vector<1x1x96xf32>
    %27 = vector.shape_cast %26 : vector<1x1x96xf32> to vector<1x96xf32>
    %28 = vector.broadcast %27 : vector<1x96xf32> to vector<16x96xf32>
    %29 = arith.addf %25, %28 : vector<16x96xf32>
    %30 = vector.extract_strided_slice %29 {offsets = [0, 0], sizes = [16, 32], strides = [1, 1]} : vector<16x96xf32> to vector<16x32xf32>
    %31 = vector.extract_strided_slice %29 {offsets = [0, 32], sizes = [16, 32], strides = [1, 1]} : vector<16x96xf32> to vector<16x32xf32>
    %32 = vector.extract_strided_slice %29 {offsets = [0, 64], sizes = [16, 32], strides = [1, 1]} : vector<16x96xf32> to vector<16x32xf32>
    %cst_15 = arith.constant dense<0.000000e+00> : vector<16x16xf32>
    %33 = tpu.matmul %31, %30, %cst_15 {dimension_numbers = #tpu.dot_dimension_numbers<[1], [1], [0], [0], [0, 0, 1, 0], [], []>} : vector<16x32xf32>, vector<16x32xf32>, vector<16x16xf32> -> vector<16x16xf32>
    %cst_16 = arith.constant -1.000000e+30 : f32
    %34 = vector.broadcast %cst_16 : f32 to vector<16x16xf32>
    %35 = arith.select %20, %33, %34 : vector<16x16xi1>, vector<16x16xf32>
    %cst_17 = arith.constant dense<0xFF800000> : vector<16xf32>
    %36 = vector.multi_reduction <maximumf>, %35, %cst_17 [1] : vector<16x16xf32> to vector<16xf32>
    %37 = vector.shape_cast %36 : vector<16xf32> to vector<16x1xf32>
    %38 = vector.broadcast %37 : vector<16x1xf32> to vector<16x16xf32>
    %39 = arith.subf %35, %38 : vector<16x16xf32>
    %40 = math.exp %39 : vector<16x16xf32>
    %cst_18 = arith.constant dense<0.000000e+00> : vector<16xf32>
    %41 = vector.multi_reduction <add>, %40, %cst_18 [1] : vector<16x16xf32> to vector<16xf32>
    %42 = vector.shape_cast %41 : vector<16xf32> to vector<16x1xf32>
    %43 = tpu.reciprocal %42 {approx = true} : vector<16x1xf32> -> vector<16x1xf32>
    %cst_19 = arith.constant dense<0.000000e+00> : vector<16x32xf32>
    %44 = tpu.matmul %40, %32, %cst_19 {dimension_numbers = #tpu.dot_dimension_numbers<[1], [0], [0], [1], [0, 0, 1, 1], [], []>} : vector<16x16xf32>, vector<16x32xf32>, vector<16x32xf32> -> vector<16x32xf32>
    %45 = vector.broadcast %43 : vector<16x1xf32> to vector<16x32xf32>
    %46 = arith.mulf %44, %45 : vector<16x32xf32>
    %c0_20 = arith.constant 0 : index
    %c0_21 = arith.constant 0 : index
    %c0_22 = arith.constant 0 : index
    %47 = vector.load %arg5[%c0_20, %c0_21, %c0_22] : memref<2x32x32xf32, #tpu.memory_space<vmem>>, vector<1x32x32xf32>
    %48 = vector.shape_cast %47 : vector<1x32x32xf32> to vector<32x32xf32>
    %cst_23 = arith.constant dense<0.000000e+00> : vector<16x32xf32>
    %49 = tpu.matmul %46, %48, %cst_23 {dimension_numbers = #tpu.dot_dimension_numbers<[1], [0], [0], [1], [0, 0, 1, 1], [], []>} : vector<16x32xf32>, vector<32x32xf32>, vector<16x32xf32> -> vector<16x32xf32>
    %50 = vector.extract_strided_slice %22 {offsets = [0, 0], sizes = [1, 32], strides = [1, 1]} : vector<6x32xf32> to vector<1x32xf32>
    %51 = vector.broadcast %50 : vector<1x32xf32> to vector<16x32xf32>
    %52 = arith.addf %49, %51 : vector<16x32xf32>
    %53 = arith.addf %52, %7 : vector<16x32xf32>
    %54 = vector.extract_strided_slice %22 {offsets = [1, 0], sizes = [1, 32], strides = [1, 1]} : vector<6x32xf32> to vector<1x32xf32>
    %55 = vector.extract_strided_slice %22 {offsets = [2, 0], sizes = [1, 32], strides = [1, 1]} : vector<6x32xf32> to vector<1x32xf32>
    %cst_24 = arith.constant dense<0.000000e+00> : vector<16xf32>
    %56 = vector.multi_reduction <add>, %53, %cst_24 [1] : vector<16x32xf32> to vector<16xf32>
    %57 = vector.shape_cast %56 : vector<16xf32> to vector<16x1xf32>
    %cst_25 = arith.constant 3.200000e+01 : f32
    %58 = vector.broadcast %cst_25 : f32 to vector<16x1xf32>
    %59 = arith.divf %57, %58 : vector<16x1xf32>
    %60 = vector.broadcast %59 : vector<16x1xf32> to vector<16x32xf32>
    %61 = arith.subf %53, %60 : vector<16x32xf32>
    %62 = arith.mulf %61, %61 : vector<16x32xf32>
    %cst_26 = arith.constant dense<0.000000e+00> : vector<16xf32>
    %63 = vector.multi_reduction <add>, %62, %cst_26 [1] : vector<16x32xf32> to vector<16xf32>
    %64 = vector.shape_cast %63 : vector<16xf32> to vector<16x1xf32>
    %cst_27 = arith.constant 3.200000e+01 : f32
    %65 = vector.broadcast %cst_27 : f32 to vector<16x1xf32>
    %66 = arith.divf %64, %65 : vector<16x1xf32>
    %cst_28 = arith.constant 9.99999974E-6 : f32
    %67 = vector.broadcast %cst_28 : f32 to vector<16x1xf32>
    %68 = arith.addf %66, %67 : vector<16x1xf32>
    %69 = math.rsqrt %68 : vector<16x1xf32>
    %70 = vector.broadcast %69 : vector<16x1xf32> to vector<16x32xf32>
    %71 = arith.mulf %61, %70 : vector<16x32xf32>
    %72 = vector.broadcast %54 : vector<1x32xf32> to vector<16x32xf32>
    %73 = arith.mulf %71, %72 : vector<16x32xf32>
    %74 = vector.broadcast %55 : vector<1x32xf32> to vector<16x32xf32>
    %75 = arith.addf %73, %74 : vector<16x32xf32>
    %c0_29 = arith.constant 0 : index
    %c0_30 = arith.constant 0 : index
    %c0_31 = arith.constant 0 : index
    %76 = vector.load %arg6[%c0_29, %c0_30, %c0_31] : memref<2x32x128xf32, #tpu.memory_space<vmem>>, vector<1x32x128xf32>
    %77 = vector.shape_cast %76 : vector<1x32x128xf32> to vector<32x128xf32>
    %cst_32 = arith.constant dense<0.000000e+00> : vector<16x128xf32>
    %78 = tpu.matmul %75, %77, %cst_32 {dimension_numbers = #tpu.dot_dimension_numbers<[1], [0], [0], [1], [0, 0, 1, 1], [], []>} : vector<16x32xf32>, vector<32x128xf32>, vector<16x128xf32> -> vector<16x128xf32>
    %c0_33 = arith.constant 0 : index
    %c0_34 = arith.constant 0 : index
    %c0_35 = arith.constant 0 : index
    %79 = vector.load %arg7[%c0_33, %c0_34, %c0_35] : memref<2x1x128xf32, #tpu.memory_space<vmem>>, vector<1x1x128xf32>
    %80 = vector.shape_cast %79 : vector<1x1x128xf32> to vector<1x128xf32>
    %81 = vector.broadcast %80 : vector<1x128xf32> to vector<16x128xf32>
    %82 = arith.addf %78, %81 : vector<16x128xf32>
    %cst_36 = arith.constant 0.000000e+00 : f32
    %83 = vector.broadcast %cst_36 : f32 to vector<16x128xf32>
    %84 = arith.maximumf %82, %83 : vector<16x128xf32>
    %c0_37 = arith.constant 0 : index
    %c0_38 = arith.constant 0 : index
    %c0_39 = arith.constant 0 : index
    %85 = vector.load %arg8[%c0_37, %c0_38, %c0_39] : memref<2x128x32xf32, #tpu.memory_space<vmem>>, vector<1x128x32xf32>
    %86 = vector.shape_cast %85 : vector<1x128x32xf32> to vector<128x32xf32>
    %cst_40 = arith.constant dense<0.000000e+00> : vector<16x32xf32>
    %87 = tpu.matmul %84, %86, %cst_40 {dimension_numbers = #tpu.dot_dimension_numbers<[1], [0], [0], [1], [0, 0, 1, 1], [], []>} : vector<16x128xf32>, vector<128x32xf32>, vector<16x32xf32> -> vector<16x32xf32>
    %88 = vector.extract_strided_slice %22 {offsets = [3, 0], sizes = [1, 32], strides = [1, 1]} : vector<6x32xf32> to vector<1x32xf32>
    %89 = vector.broadcast %88 : vector<1x32xf32> to vector<16x32xf32>
    %90 = arith.addf %87, %89 : vector<16x32xf32>
    %91 = arith.addf %90, %75 : vector<16x32xf32>
    %92 = vector.extract_strided_slice %22 {offsets = [4, 0], sizes = [1, 32], strides = [1, 1]} : vector<6x32xf32> to vector<1x32xf32>
    %93 = vector.extract_strided_slice %22 {offsets = [5, 0], sizes = [1, 32], strides = [1, 1]} : vector<6x32xf32> to vector<1x32xf32>
    %cst_41 = arith.constant dense<0.000000e+00> : vector<16xf32>
    %94 = vector.multi_reduction <add>, %91, %cst_41 [1] : vector<16x32xf32> to vector<16xf32>
    %95 = vector.shape_cast %94 : vector<16xf32> to vector<16x1xf32>
    %cst_42 = arith.constant 3.200000e+01 : f32
    %96 = vector.broadcast %cst_42 : f32 to vector<16x1xf32>
    %97 = arith.divf %95, %96 : vector<16x1xf32>
    %98 = vector.broadcast %97 : vector<16x1xf32> to vector<16x32xf32>
    %99 = arith.subf %91, %98 : vector<16x32xf32>
    %100 = arith.mulf %99, %99 : vector<16x32xf32>
    %cst_43 = arith.constant dense<0.000000e+00> : vector<16xf32>
    %101 = vector.multi_reduction <add>, %100, %cst_43 [1] : vector<16x32xf32> to vector<16xf32>
    %102 = vector.shape_cast %101 : vector<16xf32> to vector<16x1xf32>
    %cst_44 = arith.constant 3.200000e+01 : f32
    %103 = vector.broadcast %cst_44 : f32 to vector<16x1xf32>
    %104 = arith.divf %102, %103 : vector<16x1xf32>
    %cst_45 = arith.constant 9.99999974E-6 : f32
    %105 = vector.broadcast %cst_45 : f32 to vector<16x1xf32>
    %106 = arith.addf %104, %105 : vector<16x1xf32>
    %107 = math.rsqrt %106 : vector<16x1xf32>
    %108 = vector.broadcast %107 : vector<16x1xf32> to vector<16x32xf32>
    %109 = arith.mulf %99, %108 : vector<16x32xf32>
    %110 = vector.broadcast %92 : vector<1x32xf32> to vector<16x32xf32>
    %111 = arith.mulf %109, %110 : vector<16x32xf32>
    %112 = vector.broadcast %93 : vector<1x32xf32> to vector<16x32xf32>
    %113 = arith.addf %111, %112 : vector<16x32xf32>
    %c1 = arith.constant 1 : index
    %c0_46 = arith.constant 0 : index
    %c0_47 = arith.constant 0 : index
    %114 = vector.load %arg9[%c1, %c0_46, %c0_47] : memref<2x6x32xf32, #tpu.memory_space<vmem>>, vector<1x6x32xf32>
    %115 = vector.shape_cast %114 : vector<1x6x32xf32> to vector<6x32xf32>
    %c1_48 = arith.constant 1 : index
    %c0_49 = arith.constant 0 : index
    %c0_50 = arith.constant 0 : index
    %116 = vector.load %arg3[%c1_48, %c0_49, %c0_50] : memref<2x32x96xf32, #tpu.memory_space<vmem>>, vector<1x32x96xf32>
    %117 = vector.shape_cast %116 : vector<1x32x96xf32> to vector<32x96xf32>
    %cst_51 = arith.constant dense<0.000000e+00> : vector<16x96xf32>
    %118 = tpu.matmul %113, %117, %cst_51 {dimension_numbers = #tpu.dot_dimension_numbers<[1], [0], [0], [1], [0, 0, 1, 1], [], []>} : vector<16x32xf32>, vector<32x96xf32>, vector<16x96xf32> -> vector<16x96xf32>
    %c1_52 = arith.constant 1 : index
    %c0_53 = arith.constant 0 : index
    %c0_54 = arith.constant 0 : index
    %119 = vector.load %arg4[%c1_52, %c0_53, %c0_54] : memref<2x1x96xf32, #tpu.memory_space<vmem>>, vector<1x1x96xf32>
    %120 = vector.shape_cast %119 : vector<1x1x96xf32> to vector<1x96xf32>
    %121 = vector.broadcast %120 : vector<1x96xf32> to vector<16x96xf32>
    %122 = arith.addf %118, %121 : vector<16x96xf32>
    %123 = vector.extract_strided_slice %122 {offsets = [0, 0], sizes = [16, 32], strides = [1, 1]} : vector<16x96xf32> to vector<16x32xf32>
    %124 = vector.extract_strided_slice %122 {offsets = [0, 32], sizes = [16, 32], strides = [1, 1]} : vector<16x96xf32> to vector<16x32xf32>
    %125 = vector.extract_strided_slice %122 {offsets = [0, 64], sizes = [16, 32], strides = [1, 1]} : vector<16x96xf32> to vector<16x32xf32>
    %cst_55 = arith.constant dense<0.000000e+00> : vector<16x16xf32>
    %126 = tpu.matmul %124, %123, %cst_55 {dimension_numbers = #tpu.dot_dimension_numbers<[1], [1], [0], [0], [0, 0, 1, 0], [], []>} : vector<16x32xf32>, vector<16x32xf32>, vector<16x16xf32> -> vector<16x16xf32>
    %cst_56 = arith.constant -1.000000e+30 : f32
    %127 = vector.broadcast %cst_56 : f32 to vector<16x16xf32>
    %128 = arith.select %20, %126, %127 : vector<16x16xi1>, vector<16x16xf32>
    %cst_57 = arith.constant dense<0xFF800000> : vector<16xf32>
    %129 = vector.multi_reduction <maximumf>, %128, %cst_57 [1] : vector<16x16xf32> to vector<16xf32>
    %130 = vector.shape_cast %129 : vector<16xf32> to vector<16x1xf32>
    %131 = vector.broadcast %130 : vector<16x1xf32> to vector<16x16xf32>
    %132 = arith.subf %128, %131 : vector<16x16xf32>
    %133 = math.exp %132 : vector<16x16xf32>
    %cst_58 = arith.constant dense<0.000000e+00> : vector<16xf32>
    %134 = vector.multi_reduction <add>, %133, %cst_58 [1] : vector<16x16xf32> to vector<16xf32>
    %135 = vector.shape_cast %134 : vector<16xf32> to vector<16x1xf32>
    %136 = tpu.reciprocal %135 {approx = true} : vector<16x1xf32> -> vector<16x1xf32>
    %cst_59 = arith.constant dense<0.000000e+00> : vector<16x32xf32>
    %137 = tpu.matmul %133, %125, %cst_59 {dimension_numbers = #tpu.dot_dimension_numbers<[1], [0], [0], [1], [0, 0, 1, 1], [], []>} : vector<16x16xf32>, vector<16x32xf32>, vector<16x32xf32> -> vector<16x32xf32>
    %138 = vector.broadcast %136 : vector<16x1xf32> to vector<16x32xf32>
    %139 = arith.mulf %137, %138 : vector<16x32xf32>
    %c1_60 = arith.constant 1 : index
    %c0_61 = arith.constant 0 : index
    %c0_62 = arith.constant 0 : index
    %140 = vector.load %arg5[%c1_60, %c0_61, %c0_62] : memref<2x32x32xf32, #tpu.memory_space<vmem>>, vector<1x32x32xf32>
    %141 = vector.shape_cast %140 : vector<1x32x32xf32> to vector<32x32xf32>
    %cst_63 = arith.constant dense<0.000000e+00> : vector<16x32xf32>
    %142 = tpu.matmul %139, %141, %cst_63 {dimension_numbers = #tpu.dot_dimension_numbers<[1], [0], [0], [1], [0, 0, 1, 1], [], []>} : vector<16x32xf32>, vector<32x32xf32>, vector<16x32xf32> -> vector<16x32xf32>
    %143 = vector.extract_strided_slice %115 {offsets = [0, 0], sizes = [1, 32], strides = [1, 1]} : vector<6x32xf32> to vector<1x32xf32>
    %144 = vector.broadcast %143 : vector<1x32xf32> to vector<16x32xf32>
    %145 = arith.addf %142, %144 : vector<16x32xf32>
    %146 = arith.addf %145, %113 : vector<16x32xf32>
    %147 = vector.extract_strided_slice %115 {offsets = [1, 0], sizes = [1, 32], strides = [1, 1]} : vector<6x32xf32> to vector<1x32xf32>
    %148 = vector.extract_strided_slice %115 {offsets = [2, 0], sizes = [1, 32], strides = [1, 1]} : vector<6x32xf32> to vector<1x32xf32>
    %cst_64 = arith.constant dense<0.000000e+00> : vector<16xf32>
    %149 = vector.multi_reduction <add>, %146, %cst_64 [1] : vector<16x32xf32> to vector<16xf32>
    %150 = vector.shape_cast %149 : vector<16xf32> to vector<16x1xf32>
    %cst_65 = arith.constant 3.200000e+01 : f32
    %151 = vector.broadcast %cst_65 : f32 to vector<16x1xf32>
    %152 = arith.divf %150, %151 : vector<16x1xf32>
    %153 = vector.broadcast %152 : vector<16x1xf32> to vector<16x32xf32>
    %154 = arith.subf %146, %153 : vector<16x32xf32>
    %155 = arith.mulf %154, %154 : vector<16x32xf32>
    %cst_66 = arith.constant dense<0.000000e+00> : vector<16xf32>
    %156 = vector.multi_reduction <add>, %155, %cst_66 [1] : vector<16x32xf32> to vector<16xf32>
    %157 = vector.shape_cast %156 : vector<16xf32> to vector<16x1xf32>
    %cst_67 = arith.constant 3.200000e+01 : f32
    %158 = vector.broadcast %cst_67 : f32 to vector<16x1xf32>
    %159 = arith.divf %157, %158 : vector<16x1xf32>
    %cst_68 = arith.constant 9.99999974E-6 : f32
    %160 = vector.broadcast %cst_68 : f32 to vector<16x1xf32>
    %161 = arith.addf %159, %160 : vector<16x1xf32>
    %162 = math.rsqrt %161 : vector<16x1xf32>
    %163 = vector.broadcast %162 : vector<16x1xf32> to vector<16x32xf32>
    %164 = arith.mulf %154, %163 : vector<16x32xf32>
    %165 = vector.broadcast %147 : vector<1x32xf32> to vector<16x32xf32>
    %166 = arith.mulf %164, %165 : vector<16x32xf32>
    %167 = vector.broadcast %148 : vector<1x32xf32> to vector<16x32xf32>
    %168 = arith.addf %166, %167 : vector<16x32xf32>
    %c1_69 = arith.constant 1 : index
    %c0_70 = arith.constant 0 : index
    %c0_71 = arith.constant 0 : index
    %169 = vector.load %arg6[%c1_69, %c0_70, %c0_71] : memref<2x32x128xf32, #tpu.memory_space<vmem>>, vector<1x32x128xf32>
    %170 = vector.shape_cast %169 : vector<1x32x128xf32> to vector<32x128xf32>
    %cst_72 = arith.constant dense<0.000000e+00> : vector<16x128xf32>
    %171 = tpu.matmul %168, %170, %cst_72 {dimension_numbers = #tpu.dot_dimension_numbers<[1], [0], [0], [1], [0, 0, 1, 1], [], []>} : vector<16x32xf32>, vector<32x128xf32>, vector<16x128xf32> -> vector<16x128xf32>
    %c1_73 = arith.constant 1 : index
    %c0_74 = arith.constant 0 : index
    %c0_75 = arith.constant 0 : index
    %172 = vector.load %arg7[%c1_73, %c0_74, %c0_75] : memref<2x1x128xf32, #tpu.memory_space<vmem>>, vector<1x1x128xf32>
    %173 = vector.shape_cast %172 : vector<1x1x128xf32> to vector<1x128xf32>
    %174 = vector.broadcast %173 : vector<1x128xf32> to vector<16x128xf32>
    %175 = arith.addf %171, %174 : vector<16x128xf32>
    %cst_76 = arith.constant 0.000000e+00 : f32
    %176 = vector.broadcast %cst_76 : f32 to vector<16x128xf32>
    %177 = arith.maximumf %175, %176 : vector<16x128xf32>
    %c1_77 = arith.constant 1 : index
    %c0_78 = arith.constant 0 : index
    %c0_79 = arith.constant 0 : index
    %178 = vector.load %arg8[%c1_77, %c0_78, %c0_79] : memref<2x128x32xf32, #tpu.memory_space<vmem>>, vector<1x128x32xf32>
    %179 = vector.shape_cast %178 : vector<1x128x32xf32> to vector<128x32xf32>
    %cst_80 = arith.constant dense<0.000000e+00> : vector<16x32xf32>
    %180 = tpu.matmul %177, %179, %cst_80 {dimension_numbers = #tpu.dot_dimension_numbers<[1], [0], [0], [1], [0, 0, 1, 1], [], []>} : vector<16x128xf32>, vector<128x32xf32>, vector<16x32xf32> -> vector<16x32xf32>
    %181 = vector.extract_strided_slice %115 {offsets = [3, 0], sizes = [1, 32], strides = [1, 1]} : vector<6x32xf32> to vector<1x32xf32>
    %182 = vector.broadcast %181 : vector<1x32xf32> to vector<16x32xf32>
    %183 = arith.addf %180, %182 : vector<16x32xf32>
    %184 = arith.addf %183, %168 : vector<16x32xf32>
    %185 = vector.extract_strided_slice %115 {offsets = [4, 0], sizes = [1, 32], strides = [1, 1]} : vector<6x32xf32> to vector<1x32xf32>
    %186 = vector.extract_strided_slice %115 {offsets = [5, 0], sizes = [1, 32], strides = [1, 1]} : vector<6x32xf32> to vector<1x32xf32>
    %cst_81 = arith.constant dense<0.000000e+00> : vector<16xf32>
    %187 = vector.multi_reduction <add>, %184, %cst_81 [1] : vector<16x32xf32> to vector<16xf32>
    %188 = vector.shape_cast %187 : vector<16xf32> to vector<16x1xf32>
    %cst_82 = arith.constant 3.200000e+01 : f32
    %189 = vector.broadcast %cst_82 : f32 to vector<16x1xf32>
    %190 = arith.divf %188, %189 : vector<16x1xf32>
    %191 = vector.broadcast %190 : vector<16x1xf32> to vector<16x32xf32>
    %192 = arith.subf %184, %191 : vector<16x32xf32>
    %193 = arith.mulf %192, %192 : vector<16x32xf32>
    %cst_83 = arith.constant dense<0.000000e+00> : vector<16xf32>
    %194 = vector.multi_reduction <add>, %193, %cst_83 [1] : vector<16x32xf32> to vector<16xf32>
    %195 = vector.shape_cast %194 : vector<16xf32> to vector<16x1xf32>
    %cst_84 = arith.constant 3.200000e+01 : f32
    %196 = vector.broadcast %cst_84 : f32 to vector<16x1xf32>
    %197 = arith.divf %195, %196 : vector<16x1xf32>
    %cst_85 = arith.constant 9.99999974E-6 : f32
    %198 = vector.broadcast %cst_85 : f32 to vector<16x1xf32>
    %199 = arith.addf %197, %198 : vector<16x1xf32>
    %200 = math.rsqrt %199 : vector<16x1xf32>
    %201 = vector.broadcast %200 : vector<16x1xf32> to vector<16x32xf32>
    %202 = arith.mulf %192, %201 : vector<16x32xf32>
    %203 = vector.broadcast %185 : vector<1x32xf32> to vector<16x32xf32>
    %204 = arith.mulf %202, %203 : vector<16x32xf32>
    %205 = vector.broadcast %186 : vector<1x32xf32> to vector<16x32xf32>
    %206 = arith.addf %204, %205 : vector<16x32xf32>
    %207 = tpu.concatenate %206, %7 in 1 : vector<16x32xf32>, vector<16x32xf32> -> vector<16x64xf32>
    %c0_86 = arith.constant 0 : index
    %c0_87 = arith.constant 0 : index
    %208 = vector.load %arg10[%c0_86, %c0_87] : memref<64x32xf32, #tpu.memory_space<vmem>>, vector<64x32xf32>
    %cst_88 = arith.constant dense<0.000000e+00> : vector<16x32xf32>
    %209 = tpu.matmul %207, %208, %cst_88 {dimension_numbers = #tpu.dot_dimension_numbers<[1], [0], [0], [1], [0, 0, 1, 1], [], []>} : vector<16x64xf32>, vector<64x32xf32>, vector<16x32xf32> -> vector<16x32xf32>
    %c0_89 = arith.constant 0 : index
    %c0_90 = arith.constant 0 : index
    %210 = vector.load %arg11[%c0_89, %c0_90] : memref<3x32xf32, #tpu.memory_space<vmem>>, vector<1x32xf32>
    %211 = vector.broadcast %210 : vector<1x32xf32> to vector<16x32xf32>
    %212 = arith.addf %209, %211 : vector<16x32xf32>
    %c1_91 = arith.constant 1 : index
    %c0_92 = arith.constant 0 : index
    %213 = vector.load %arg11[%c1_91, %c0_92] : memref<3x32xf32, #tpu.memory_space<vmem>>, vector<1x32xf32>
    %c2 = arith.constant 2 : index
    %c0_93 = arith.constant 0 : index
    %214 = vector.load %arg11[%c2, %c0_93] : memref<3x32xf32, #tpu.memory_space<vmem>>, vector<1x32xf32>
    %cst_94 = arith.constant dense<0.000000e+00> : vector<16xf32>
    %215 = vector.multi_reduction <add>, %212, %cst_94 [1] : vector<16x32xf32> to vector<16xf32>
    %216 = vector.shape_cast %215 : vector<16xf32> to vector<16x1xf32>
    %cst_95 = arith.constant 3.200000e+01 : f32
    %217 = vector.broadcast %cst_95 : f32 to vector<16x1xf32>
    %218 = arith.divf %216, %217 : vector<16x1xf32>
    %219 = vector.broadcast %218 : vector<16x1xf32> to vector<16x32xf32>
    %220 = arith.subf %212, %219 : vector<16x32xf32>
    %221 = arith.mulf %220, %220 : vector<16x32xf32>
    %cst_96 = arith.constant dense<0.000000e+00> : vector<16xf32>
    %222 = vector.multi_reduction <add>, %221, %cst_96 [1] : vector<16x32xf32> to vector<16xf32>
    %223 = vector.shape_cast %222 : vector<16xf32> to vector<16x1xf32>
    %cst_97 = arith.constant 3.200000e+01 : f32
    %224 = vector.broadcast %cst_97 : f32 to vector<16x1xf32>
    %225 = arith.divf %223, %224 : vector<16x1xf32>
    %cst_98 = arith.constant 9.99999974E-6 : f32
    %226 = vector.broadcast %cst_98 : f32 to vector<16x1xf32>
    %227 = arith.addf %225, %226 : vector<16x1xf32>
    %228 = math.rsqrt %227 : vector<16x1xf32>
    %229 = vector.broadcast %228 : vector<16x1xf32> to vector<16x32xf32>
    %230 = arith.mulf %220, %229 : vector<16x32xf32>
    %231 = vector.broadcast %213 : vector<1x32xf32> to vector<16x32xf32>
    %232 = arith.mulf %230, %231 : vector<16x32xf32>
    %233 = vector.broadcast %214 : vector<1x32xf32> to vector<16x32xf32>
    %234 = arith.addf %232, %233 : vector<16x32xf32>
    %c0_99 = arith.constant 0 : index
    %c0_100 = arith.constant 0 : index
    %235 = vector.load %arg12[%c0_99, %c0_100] : memref<16x32xf32, #tpu.memory_space<vmem>>, vector<16x32xf32>
    tpu.vector_store %arg12[%c0_99, %c0_100], %234 {strides = array<i32>} : memref<16x32xf32, #tpu.memory_space<vmem>>, vector<16x32xf32>,
    return
  }
  func.func @transform_0(%arg0: i32) -> (i32, i32) {
    %c0_i32 = arith.constant 0 : i32
    %c0_i32_0 = arith.constant 0 : i32
    return %arg0, %c0_i32 : i32, i32
  }
  func.func @transform_1(%arg0: i32) -> (i32, i32) {
    %c0_i32 = arith.constant 0 : i32
    %c0_i32_0 = arith.constant 0 : i32
    %c0_i32_1 = arith.constant 0 : i32
    return %c0_i32, %c0_i32_0 : i32, i32
  }
  func.func @transform_2(%arg0: i32) -> (i32, i32, i32) {
    %c0_i32 = arith.constant 0 : i32
    %c0_i32_0 = arith.constant 0 : i32
    %c0_i32_1 = arith.constant 0 : i32
    %c0_i32_2 = arith.constant 0 : i32
    return %c0_i32, %c0_i32_0, %c0_i32_1 : i32, i32, i32
  }
  func.func @transform_3(%arg0: i32) -> (i32, i32, i32) {
    %c0_i32 = arith.constant 0 : i32
    %c0_i32_0 = arith.constant 0 : i32
    %c0_i32_1 = arith.constant 0 : i32
    %c0_i32_2 = arith.constant 0 : i32
    return %c0_i32, %c0_i32_0, %c0_i32_1 : i32, i32, i32
  }
  func.func @transform_4(%arg0: i32) -> (i32, i32, i32) {
    %c0_i32 = arith.constant 0 : i32
    %c0_i32_0 = arith.constant 0 : i32
    %c0_i32_1 = arith.constant 0 : i32
    %c0_i32_2 = arith.constant 0 : i32
    return %c0_i32, %c0_i32_0, %c0_i32_1 : i32, i32, i32
  }
  func.func @transform_5(%arg0: i32) -> (i32, i32, i32) {
    %c0_i32 = arith.constant 0 : i32
    %c0_i32_0 = arith.constant 0 : i32
    %c0_i32_1 = arith.constant 0 : i32
    %c0_i32_2 = arith.constant 0 : i32
    return %c0_i32, %c0_i32_0, %c0_i32_1 : i32, i32, i32
  }
  func.func @transform_6(%arg0: i32) -> (i32, i32, i32) {
    %c0_i32 = arith.constant 0 : i32
    %c0_i32_0 = arith.constant 0 : i32
    %c0_i32_1 = arith.constant 0 : i32
    %c0_i32_2 = arith.constant 0 : i32
    return %c0_i32, %c0_i32_0, %c0_i32_1 : i32, i32, i32
  }
  func.func @transform_7(%arg0: i32) -> (i32, i32, i32) {
    %c0_i32 = arith.constant 0 : i32
    %c0_i32_0 = arith.constant 0 : i32
    %c0_i32_1 = arith.constant 0 : i32
    %c0_i32_2 = arith.constant 0 : i32
    return %c0_i32, %c0_i32_0, %c0_i32_1 : i32, i32, i32
  }
  func.func @transform_8(%arg0: i32) -> (i32, i32, i32) {
    %c0_i32 = arith.constant 0 : i32
    %c0_i32_0 = arith.constant 0 : i32
    %c0_i32_1 = arith.constant 0 : i32
    %c0_i32_2 = arith.constant 0 : i32
    return %c0_i32, %c0_i32_0, %c0_i32_1 : i32, i32, i32
  }
  func.func @transform_9(%arg0: i32) -> (i32, i32) {
    %c0_i32 = arith.constant 0 : i32
    %c0_i32_0 = arith.constant 0 : i32
    %c0_i32_1 = arith.constant 0 : i32
    return %c0_i32, %c0_i32_0 : i32, i32
  }
  func.func @transform_10(%arg0: i32) -> (i32, i32) {
    %c0_i32 = arith.constant 0 : i32
    %c0_i32_0 = arith.constant 0 : i32
    %c0_i32_1 = arith.constant 0 : i32
    return %c0_i32, %c0_i32_0 : i32, i32
  }
  func.func @transform_11(%arg0: i32) -> (i32, i32) {
    %c0_i32 = arith.constant 0 : i32
    %c0_i32_0 = arith.constant 0 : i32
    return %arg0, %c0_i32 : i32, i32
  }
}

</mosaic_0001>

<bundles_post_ra>
// kernel: transformer_forward.1
= control target key start
LH: loop header
LB: loop body
LE: loop exit
PB: predicated region body
PF: predicated region fallthrough
CT: control target
= control target key end

     0   :  { %v2229_v2 = vmov 0   ;;  %s2750_s0 = inlined_call_operand.vmem [shape: s32[16,1], index: 0, kind: input, shape index: {}]   ;;  %s2751_s1 = inlined_call_operand.vmem [shape: f32[32,32], index: 1, kind: input, shape index: {}]   ;;  %s2752_s2 = inlined_call_operand.vmem [shape: f32[2,32,96], index: 2, kind: input, shape index: {}]   ;;  %s2753_s3 = inlined_call_operand.vmem [shape: f32[2,1,96], index: 3, kind: input, shape index: {}]   ;;  %s2754_s4 = inlined_call_operand.vmem [shape: f32[2,32,32], index: 4, kind: input, shape index: {}]   ;;  %s2755_s5 = inlined_call_operand.vmem [shape: f32[2,32,128], index: 5, kind: input, shape index: {}]   ;;  %s2756_s6 = inlined_call_operand.vmem [shape: f32[2,1,128], index: 6, kind: input, shape index: {}]   ;;  %s2757_s7 = inlined_call_operand.vmem [shape: f32[2,128,32], index: 7, kind: input, shape index: {}]   ;;  %s2758_s8 = inlined_call_operand.vmem [shape: f32[2,6,32], index: 8, kind: input, shape index: {}]   ;;  %s2759_s9 = inlined_call_operand.vmem [shape: f32[64,32], index: 9, kind: input, shape index: {}]   ;;  %s2760_s10 = inlined_call_operand.vmem [shape: f32[3,32], index: 10, kind: input, shape index: {}]   ;;  %s2761_s11 = inlined_call_operand.hbm [shape: f32[16,32], index: 11, kind: output, shape index: {}]  }
   0x1   :  { %v39_v0 = vld [vmem:[%s2750_s0] sm:$0xff]  ;;  %2158 = vset.pattern.permute.xlu0 %v2229_v2  ;;  %v56_v3 = vld [vmem:[%s2751_s1 + $0x8] sm:$0xff]  ;;  %v57_v4 = vld [vmem:[%s2751_s1 + $0x10] sm:$0xff] }
   0x2   :  { %v55_v1 = vld [vmem:[%s2751_s1] sm:$0xff]  ;;  %v58_v5 = vld [vmem:[%s2751_s1 + $0x18] sm:$0xff]  ;;  %44 = vperm.xlu0 %2158, %v39_v0  }
   0x3   :  { %v1994_v6 = vpack.c.bf16 %v56_v3, %v55_v1  ;;  %v1998_v7 = vpack.c.bf16 %v58_v5, %v57_v4 }
   0x4   :  { %16 = vsyncpa [#allocation3], 0  ;;  %v40_v8 = vld [vmem:[%s2750_s0 + $0x8] sm:$0xff]  ;;  %v157_v9 = vld [vmem:[%s2752_s2] sm:$0xff]  ;;  %v41_v15 = vlaneseq  ;;  %vm59_vm0 = vcmask 261120   ;;  %v2230_v18 = vmov 0.0  }
   0x5   :  { %1995 = vmatprep.subr.bf16.mxu0 %v1994_v6  ;;  %v158_v10 = vld [vmem:[%s2752_s2 + $0x8] sm:$0xff]  ;;  %v159_v11 = vld [vmem:[%s2752_s2 + $0x10] sm:$0xff]  ;;  %v160_v13 = vld [vmem:[%s2752_s2 + $0x18] sm:$0xff]  ;;  %s2231_s18 = smov 96   ;;  %vm340_vm10 = vcmask 130048   ;;  %s2232_s19 = smov 64  }
   0x6   :  { %1997 = vmatpush3.bf16.msra.mxu0 %v1994_v6  ;;  %47 = vperm.xlu0 %2158, %v40_v8   ;;  %v2002_v12 = vpack.c.bf16 %v158_v10, %v157_v9  ;;  %v2006_v14 = vpack.c.bf16 %v160_v13, %v159_v11  ;;  %v42_v16 = vand.u32 127, %v41_v15  ;;  %v1632_v24 = vld [vmem:[%s2753_s3] ss:$0 sm:$0xff]  ;;  %vm2342_vm3 = vmpackc.low %vm59_vm0, %vm59_vm0  ;;  %v2354_v34 = vshrl.u32 %v41_v15, 7  ;;  %v451_v3 = vld [vmem:[%s2754_s4 + $0x8] sm:$0xff]  ;;  %s2234_s21 = smov [#allocation2]  }
   0x7   :  { %1999 = vmatprep.subr.bf16.mxu0 %v1998_v7  ;;  %v450_v2 = vld [vmem:[%s2754_s4] sm:$0xff]  ;;  %v452_v5 = vld [vmem:[%s2754_s4 + $0x10] sm:$0xff]  ;;  %v453_v6 = vld [vmem:[%s2754_s4 + $0x18] sm:$0xff]  ;;  %vm1488_vm11 = vcmask 523264   ;;  %s1617_s22 = sshll.u32 %s2234_s21, 4  ;;  %s1618_s22 = int_to_ptr.vmem [resolvable:$true] %s1617_s22 }
   0x8   :  { %2003 = vmatprep.subr.bf16.mxu1 %v2002_v12  ;;  %v143_v35 = vadd.s32 8, %v2354_v34  ;;  %v146_v37 = vshra.s32 %v42_v16, 3  ;;  %v151_v39 = vand.u32 7, %v42_v16  ;;  %v144_v40 = vshra.s32 %v2354_v34, 3  ;;  %p2210_p1 = scmp.lt.s32.totalorder %s1618_s22, %s1618_s22 }
   0x9   :  { %2005 = vmatpush3.bf16.msra.mxu1 %v2002_v12  ;;  %v149_v41 = vand.u32 7, %v2354_v34  ;;  %v2020_v4 = vpack.c.bf16 %v451_v3, %v450_v2  ;;  %v684_v2 = vld [vmem:[%s2757_s7 + $0x50] sm:$0xff]  ;;  %v685_v3 = vld [vmem:[%s2757_s7 + $0x58] sm:$0xff] }
   0xa   :  { %2001 = vmatpush3.bf16.msra.mxu0 %v1998_v7  ;;  %2007 = vmatprep.subr.bf16.mxu1 %v2006_v14  ;;  %v145_v36 = vshra.s32 %v143_v35, 3  ;;  %v150_v38 = vand.u32 7, %v143_v35  ;;  %vm2367_vm6 = vcmp.eq.s32.totalorder %v144_v40, %v146_v37  ;;  %v2024_v7 = vpack.c.bf16 %v453_v6, %v452_v5  ;;  %v686_v5 = vld [vmem:[%s2757_s7 + $0x60] sm:$0xff]  ;;  %v687_v6 = vld [vmem:[%s2757_s7 + $0x68] sm:$0xff] }
   0xb   :  { %vm2371_vm7 = vcmp.ge.s32.totalorder %v149_v41, %v151_v39  ;;  %v580_v41 = vld [vmem:[%s2755_s5] sm:$0xff] }
   0xc   :  { %vm2359_vm4 = vcmp.eq.s32.totalorder %v145_v36, %v146_v37  ;;  %vm2363_vm5 = vcmp.ge.s32.totalorder %v150_v38, %v151_v39  ;;  %vm154_vm9 = vmand %vm2367_vm6, %vm2371_vm7 }
   0xd   :  { %2009 = vmatpush3.bf16.msra.mxu1 %v2006_v14  ;;  %vm155_vm8 = vmand %vm2359_vm4, %vm2363_vm5 }
   0xe   :  { %2021 = vmatprep.subr.bf16.mxu1 %v2020_v4 }
  0x81   :  { %v45_v17 = vpop.permute.xlu0 %44 }
  0x82   :  { %vm49_vm1 = vcmp.eq.s32.totalorder %v45_v17, %v42_v16  ;;  %v2418_v17 = vld [vmem:[%s2758_s8] sm:$0x3f] }
  0x83   :  { %v1628_v19 = vsel %vm49_vm1, 1.0, %v2230_v18 }
  0x84   :  { %1808 = vmatprep.mubr.msk.f32.mxu0 %vm59_vm0, %v1628_v19 }
  0x85   :  { %v48_v20 = vpop.permute.xlu0 %47 }
  0x86   :  { %vm50_vm2 = vcmp.eq.s32.totalorder %v48_v20, %v42_v16  ;;  %v456_v16 = vsub.s32 0, %v2354_v34 }
  0x87   :  { %v1629_v21 = vsel %vm50_vm2, 1.0, %v2230_v18 }
  0x88   :  { %1809 = vmatmul.mubr.msk.f32.vlgmr.msra.gmra.mrb[0].mxu0 %vm59_vm0, %v1629_v21  ;;  %v457_v18 = vrot.slane %v2418_v17, %v456_v16 }
 0x15b   :  { %v2329_v22 = vpop.f32.mrb[0].mxu0 }
 0x15c   :  { %v2331_v23 = vpop.f32.mrb[1].mxu0 }
 0x15d   :  { %1819 = vmatprep.mubr.msk.f32.mxu1 %vm59_vm0, %v2331_v23 }
 0x15e   :  { %1820 = vmatmul.mubr.msk.f32.vlgmr.msra.gmra.mrb[0].mxu1 %vm59_vm0, %v2329_v22 }
 0x15f   :  { %2023 = vmatpush3.bf16.msra.mxu1 %v2020_v4  ;;  %v2056_v4 = vpack.c.bf16 %v685_v3, %v684_v2  ;;  %v1647_v2 = vld [vmem:[%s2752_s2 + $0x20] sm:$0xff]  ;;  %v1648_v3 = vld [vmem:[%s2752_s2 + $0x28] sm:$0xff] }
 0x160   :  { %2025 = vmatprep.subr.bf16.mxu1 %v2024_v7 }
 0x163   :  { %2027 = vmatpush3.bf16.msra.mxu1 %v2024_v7  ;;  %v2060_v7 = vpack.c.bf16 %v687_v6, %v686_v5  ;;  %v1649_v5 = vld [vmem:[%s2752_s2 + $0x30] sm:$0xff]  ;;  %v1650_v6 = vld [vmem:[%s2752_s2 + $0x38] sm:$0xff]  ;;  %s2205_s2 = scalar_lea.vmem %s1618_s22, 256 }
 0x164   :  { %p2206_p0 = scmp.ne.s32.totalorder %s1618_s22, %s2205_s2  ;;  %p2211_p2 = scmp.lt.s32.totalorder %s2205_s2, %s2205_s2 }
 0x166   :  { %p2212_p3 = por %p2211_p2, %p2210_p1 }
 0x168   :  { %p2213_p4 = pnand %p2212_p3, %p2206_p0 }
 0x231   :  { %v1821_v25 = vpop.f32.mrb[0].mxu1 }
 0x232   :  { %v246_v26 = vadd.f32 %v1821_v25, %v1632_v24  ;;  %v240_v27 = vpop.f32.mrb[1].mxu1 }
 0x233   :  { %v241_v28 = vadd.f32 %v1632_v24, %v240_v27 }
 0x235   :  { %v2010_v30 = vpack.c.bf16 %v246_v26, %v241_v28  ;;  %251 = vrot.lane.b32.xlu1 %v241_v28, %s2231_s18  ;;  %v2159_v31 = vpack.i.bf16 %v246_v26, %v241_v28 }
 0x237   :  { %2012 = vmatprep.subr.msk.bf16.mxu0 %vm2342_vm3, %v2010_v30 }
 0x238   :  { %2015 = vmatpush3.bf16.xpose.msk.msra.mxu0 %vm2342_vm3, %v2010_v30 }
 0x239   :  { %253 = vrot.lane.b32.xlu1 %v246_v26, %s2231_s18 }
 0x2a7   :  { %v252_v32 = vpop.permute.xlu1 %251 }
 0x2a8   :  { %1826 = vmatprep.mubr.msk.f32.mxu0 %vm59_vm0, %v252_v32 }
 0x2ab   :  { %v254_v33 = vpop.permute.xlu1 %253 }
 0x2ac   :  { %1827 = vmatmul.mubr.msk.f32.vlgmr.msra.gmra.mrb[2].mxu0 %vm59_vm0, %v254_v33 }
 0x37f   :  { %v1828_v46 = vpop.f32.mrb[2].mxu0 }
 0x380   :  { %v339_v47 = vsel %vm155_vm8, %v1828_v46, -1e+30  ;;  %v329_v48 = vpop.f32.mrb[3].mxu0  ;;  %v581_v46 = vld [vmem:[%s2755_s5 + $0x8] sm:$0xff] }
 0x381   :  { %v338_v49 = vsel %vm154_vm9, %v329_v48, -1e+30  ;;  %v344_v50 = vsel %vm340_vm10, %v339_v47, -inf  ;;  %v582_v48 = vld [vmem:[%s2755_s5 + $0x10] sm:$0xff] }
 0x382   :  { %345 = vmax.xlane.f32.xlu1 %v344_v50  ;;  %v341_v51 = vsel %vm340_vm10, %v338_v49, -inf }
 0x383   :  { %342 = vmax.xlane.f32.xlu0 %v341_v51  ;;  %v674_v51 = vld [vmem:[%s2757_s7] sm:$0xff] }
 0x399   :  { %2160 = vrot.lane.b32.xlu0 %v2159_v31, %s2232_s19 }
 0x40f   :  { %v346_v52 = vpop.xlane.xlu1 %345 }
 0x410   :  { %v348_v53 = vsub.f32 %v339_v47, %v346_v52  ;;  %v343_v54 = vpop.xlane.xlu0 %342  ;;  %v2028_v47 = vpack.c.bf16 %v581_v46, %v580_v41  ;;  %v675_v52 = vld [vmem:[%s2757_s7 + $0x8] sm:$0xff]  ;;  %v692_v46 = vsub.s32 3, %v2354_v34 }
 0x411   :  { %v347_v55 = vsub.f32 %v338_v49, %v343_v54  ;;  %v583_v49 = vld [vmem:[%s2755_s5 + $0x18] sm:$0xff]  ;;  %v2036_v54 = vpack.c.bf16 %v675_v52, %v674_v51 }
 0x412   :  { %v351_v56 = vmul.f32 1.442695, %v348_v53  ;;  %v2032_v50 = vpack.c.bf16 %v583_v49, %v582_v48  ;;  %v676_v53 = vld [vmem:[%s2757_s7 + $0x10] sm:$0xff] }
 0x413   :  { %v349_v57 = vmul.f32 1.442695, %v347_v55  ;;  %v677_v55 = vld [vmem:[%s2757_s7 + $0x18] sm:$0xff]  ;;  %2037 = vmatprep.subr.bf16.mxu1 %v2036_v54 }
 0x414   :  { %v2161_v58 = vpop.permute.xlu0 %2160 }
 0x415   :  { %2169 = vpow2.f32 %v349_v57  ;;  %v2163_v59 = vunpack.i.h.bf16 %v2161_v58  ;;  %v2162_v60 = vunpack.i.l.bf16 %v2161_v58  ;;  %v678_v57 = vld [vmem:[%s2757_s7 + $0x20] sm:$0xff]  ;;  %v679_v58 = vld [vmem:[%s2757_s7 + $0x28] sm:$0xff] }
 0x416   :  { %2171 = vpow2.f32 %v351_v56  ;;  %v2040_v56 = vpack.c.bf16 %v677_v55, %v676_v53 }
 0x417   :  { %v2016_v61 = vpack.c.bf16 %v2163_v59, %v2162_v60  ;;  %v2044_v59 = vpack.c.bf16 %v679_v58, %v678_v57  ;;  %v680_v60 = vld [vmem:[%s2757_s7 + $0x30] sm:$0xff] }
 0x419   :  { %2017 = vmatprep.subr.bf16.mxu0 %v2016_v61 }
 0x41a   :  { %2019 = vmatpush3.bf16.msra.mxu0 %v2016_v61  ;;  %v681_v61 = vld [vmem:[%s2757_s7 + $0x38] sm:$0xff] }
 0x41b   :  { %2029 = vmatprep.subr.bf16.mxu0 %v2028_v47 }
 0x41f   :  { %v2170_v62 = vpop.eup %2169 }
 0x420   :  { %v2172_v63 = vpop.eup %2171  ;;  %1833 = vmatprep.mubr.msk.f32.mxu0 %vm340_vm10, %v2170_v62  ;;  %v353_v0 = vsel %vm340_vm10, %v2170_v62, 0.0  ;;  %v2048_v62 = vpack.c.bf16 %v681_v61, %v680_v60 }
 0x421   :  { %354 = vadd.xlane.f32.xlu1 %v353_v0  ;;  %1834 = vmatmul.mubr.msk.f32.vlgmr.msra.gmra.mrb[4].mxu0 %vm340_vm10, %v2172_v63  ;;  %v356_v1 = vsel %vm340_vm10, %v2172_v63, 0.0  ;;  %v682_v63 = vld [vmem:[%s2757_s7 + $0x40] sm:$0xff]  ;;  %v683_v0 = vld [vmem:[%s2757_s7 + $0x48] sm:$0xff] }
 0x422   :  { %2031 = vmatpush3.bf16.msra.mxu0 %v2028_v47  ;;  %v693_v47 = vrot.slane %v2418_v17, %v692_v46 }
 0x423   :  { %2033 = vmatprep.subr.bf16.mxu0 %v2032_v50 }
 0x425   :  { %357 = vadd.xlane.f32.xlu1 %v356_v1  ;;  %v2052_v1 = vpack.c.bf16 %v683_v0, %v682_v63 }
 0x426   :  { %2035 = vmatpush3.bf16.msra.mxu0 %v2032_v50 }
 0x4ae   :  { %v355_v8 = vpop.xlane.xlu1 %354 }
 0x4af   :  { %2173 = vrcp.f32 %v355_v8 }
 0x4b2   :  { %v358_v9 = vpop.xlane.xlu1 %357 }
 0x4b3   :  { %2175 = vrcp.f32 %v358_v9 }
 0x4b9   :  { %v2174_v11 = vpop.eup %2173 }
 0x4bd   :  { %v2176_v13 = vpop.eup %2175 }
 0x4f4   :  { %v1835_v10 = vpop.f32.mrb[4].mxu0 }
 0x4f5   :  { %v439_v12 = vpop.f32.mrb[5].mxu0  ;;  %v449_v15 = vmul.f32 %v2176_v13, %v1835_v10 }
 0x4f6   :  { %v448_v14 = vmul.f32 %v2174_v11, %v439_v12 }
 0x4f8   :  { %1844 = vmatprep.mubr.msk.f32.mxu1 %vm59_vm0, %v448_v14  ;;  %v570_v14 = vsub.s32 1, %v2354_v34 }
 0x4f9   :  { %1845 = vmatmul.mubr.msk.f32.vlgmr.msra.gmra.mrb[2].mxu1 %vm59_vm0, %v449_v15  ;;  %v576_v15 = vsub.s32 2, %v2354_v34 }
 0x4fa   :  { %2039 = vmatpush3.bf16.msra.mxu1 %v2036_v54 }
 0x4fb   :  { %2041 = vmatprep.subr.bf16.mxu1 %v2040_v56 }
 0x4fe   :  { %2043 = vmatpush3.bf16.msra.mxu1 %v2040_v56 }
 0x4ff   :  { %2045 = vmatprep.subr.bf16.mxu1 %v2044_v59 }
 0x502   :  { %2047 = vmatpush3.bf16.msra.mxu1 %v2044_v59 }
 0x503   :  { %2049 = vmatprep.subr.bf16.mxu1 %v2048_v62 }
 0x506   :  { %2051 = vmatpush3.bf16.msra.mxu1 %v2048_v62 }
 0x507   :  { %2053 = vmatprep.subr.bf16.mxu1 %v2052_v1 }
 0x50a   :  { %2055 = vmatpush3.bf16.msra.mxu1 %v2052_v1 }
 0x50b   :  { %2057 = vmatprep.subr.bf16.mxu1 %v2056_v4 }
 0x50e   :  { %2059 = vmatpush3.bf16.msra.mxu1 %v2056_v4  ;;  %v2068_v4 = vpack.c.bf16 %v1648_v3, %v1647_v2  ;;  %v1664_v2 = vld [vmem:[%s2754_s4 + $0x38] sm:$0xff] }
 0x50f   :  { %2061 = vmatprep.subr.bf16.mxu1 %v2060_v7 }
 0x510   :  { %2069 = vmatprep.subr.bf16.mxu0 %v2068_v4 }
 0x512   :  { %2063 = vmatpush3.bf16.msra.mxu1 %v2060_v7  ;;  %v2072_v7 = vpack.c.bf16 %v1650_v6, %v1649_v5 }
 0x5cc   :  { %v1846_v19 = vpop.f32.mrb[2].mxu1 }
 0x5cd   :  { %v536_v20 = vadd.f32 %v1846_v19, %v457_v18  ;;  %v530_v21 = vpop.f32.mrb[3].mxu1 }
 0x5ce   :  { %v531_v24 = vadd.f32 %v530_v21, %v457_v18  ;;  %v571_v18 = vrot.slane %v2418_v17, %v570_v14  ;;  %v577_v21 = vrot.slane %v2418_v17, %v576_v15 }
 0x5cf   :  { %v540_v25 = vadd.f32 %v2329_v22, %v536_v20 }
 0x5d0   :  { %v539_v26 = vadd.f32 %v531_v24, %v2331_v23 }
 0x5d1   :  { %v544_v28 = vsel %vm59_vm0, %v540_v25, 0.0 }
 0x5d2   :  { %v541_v27 = vsel %vm59_vm0, %v539_v26, 0.0 }
 0x5d3   :  { %542 = vadd.xlane.f32.xlu1 %v541_v27 }
 0x5d7   :  { %545 = vadd.xlane.f32.xlu1 %v544_v28 }
 0x660   :  { %v543_v30 = vpop.xlane.xlu1 %542 }
 0x661   :  { %v548_v31 = vmul.f32 0.03125, %v543_v30 }
 0x663   :  { %v2427_v32 = vsub.f32 %v539_v26, %v548_v31  ;;  %v688_v31 = vld [vmem:[%s2757_s7 + $0x70] sm:$0xff] }
 0x664   :  { %v546_v33 = vpop.xlane.xlu1 %545 }
 0x665   :  { %v549_v35 = vmul.f32 0.03125, %v546_v33  ;;  %v552_v36 = vmul.f32 %v2427_v32, %v2427_v32 }
 0x667   :  { %v2431_v37 = vsub.f32 %v540_v25, %v549_v35  ;;  %v554_v38 = vsel %vm59_vm0, %v552_v36, 0.0  ;;  %v1643_v35 = vld [vmem:[%s2756_s6] ss:$0 sm:$0xff] }
 0x668   :  { %555 = vadd.xlane.f32.xlu1 %v554_v38 }
 0x669   :  { %v553_v39 = vmul.f32 %v2431_v37, %v2431_v37 }
 0x66b   :  { %v557_v40 = vsel %vm59_vm0, %v553_v39, 0.0 }
 0x66c   :  { %558 = vadd.xlane.f32.xlu0 %v557_v40 }
 0x6f5   :  { %v556_v8 = vpop.xlane.xlu1 %555 }
 0x6f6   :  { %v560_v9 = vmul.f32 0.03125, %v556_v8 }
 0x6f8   :  { %v562_v10 = vadd.f32 1e-05, %v560_v9 }
 0x6f9   :  { %v559_v11 = vpop.xlane.xlu0 %558 }
 0x6fa   :  { %2177 = vrsqrt.f32 %v562_v10  ;;  %v561_v12 = vmul.f32 0.03125, %v559_v11 }
 0x6fc   :  { %v563_v13 = vadd.f32 1e-05, %v561_v12 }
 0x6fe   :  { %2179 = vrsqrt.f32 %v563_v13 }
 0x704   :  { %v2178_v19 = vpop.eup %2177 }
 0x705   :  { %v566_v20 = vmul.f32 %v2178_v19, %v2427_v32  ;;  %v689_v32 = vld [vmem:[%s2757_s7 + $0x78] sm:$0xff]  ;;  %v805_v19 = vsub.s32 5, %v2354_v34 }
 0x706   :  { %v2064_v33 = vpack.c.bf16 %v689_v32, %v688_v31 }
 0x707   :  { %v572_v24 = vmul.f32 %v571_v18, %v566_v20 }
 0x708   :  { %v2180_v25 = vpop.eup %2179  ;;  %2065 = vmatprep.subr.bf16.mxu1 %v2064_v33 }
 0x709   :  { %v567_v26 = vmul.f32 %v2180_v25, %v2431_v37  ;;  %v578_v27 = vadd.f32 %v577_v21, %v572_v24  ;;  %2067 = vmatpush3.bf16.msra.mxu1 %v2064_v33  ;;  %v806_v25 = vrot.slane %v2418_v17, %v805_v19  ;;  %v1652_v33 = vld [vmem:[%s2753_s3 + $0x1] ss:$0 sm:$0xff] }
 0x70b   :  { %v573_v28 = vmul.f32 %v571_v18, %v567_v26  ;;  %1855 = vmatprep.mubr.msk.f32.mxu0 %vm59_vm0, %v578_v27  ;;  %v799_v18 = vsub.s32 4, %v2354_v34  ;;  %v1691_v34 = vld [vmem:[%s2760_s10] ss:$0 sm:$0xff] }
 0x70d   :  { %v579_v30 = vadd.f32 %v577_v21, %v573_v28  ;;  %v800_v20 = vrot.slane %v2418_v17, %v799_v18 }
 0x70f   :  { %1856 = vmatmul.mubr.msk.f32.vlgmr.msra.gmra.mrb[6].mxu0 %vm59_vm0, %v579_v30 }
 0x710   :  { %2071 = vmatpush3.bf16.msra.mxu0 %v2068_v4 }
 0x711   :  { %2073 = vmatprep.subr.bf16.mxu0 %v2072_v7 }
 0x714   :  { %2075 = vmatpush3.bf16.msra.mxu0 %v2072_v7 }
 0x7e2   :  { %v1857_v36 = vpop.f32.mrb[6].mxu0 }
 0x7e3   :  { %v669_v37 = vadd.f32 %v1857_v36, %v1643_v35  ;;  %v663_v38 = vpop.f32.mrb[7].mxu0 }
 0x7e4   :  { %v664_v39 = vadd.f32 %v1643_v35, %v663_v38 }
 0x7e5   :  { %v673_v41 = vmax.f32 %v669_v37, 0.0 }
 0x7e6   :  { %v672_v40 = vmax.f32 %v664_v39, 0.0 }
 0x7e8   :  { %1890 = vmatprep.mubr.f32.mxu1 %v672_v40 }
 0x7e9   :  { %1891 = vmatmul.mubr.f32.vlgmr.msra.gmra.mrb[4].mxu1 %v673_v41 }
 0x8bc   :  { %v1892_v48 = vpop.f32.mrb[4].mxu1 }
 0x8bd   :  { %v760_v49 = vpop.f32.mrb[5].mxu1  ;;  %v766_v50 = vadd.f32 %v1892_v48, %v693_v47 }
 0x8be   :  { %v761_v51 = vadd.f32 %v760_v49, %v693_v47 }
 0x8bf   :  { %v770_v54 = vadd.f32 %v766_v50, %v579_v30 }
 0x8c0   :  { %v769_v52 = vadd.f32 %v761_v51, %v578_v27 }
 0x8c1   :  { %v774_v55 = vsel %vm59_vm0, %v770_v54, 0.0 }
 0x8c2   :  { %v771_v53 = vsel %vm59_vm0, %v769_v52, 0.0 }
 0x8c3   :  { %772 = vadd.xlane.f32.xlu1 %v771_v53 }
 0x8c7   :  { %775 = vadd.xlane.f32.xlu1 %v774_v55 }
 0x950   :  { %v773_v56 = vpop.xlane.xlu1 %772 }
 0x951   :  { %v777_v57 = vmul.f32 0.03125, %v773_v56 }
 0x953   :  { %v779_v58 = vsub.f32 %v769_v52, %v777_v57 }
 0x954   :  { %v776_v59 = vpop.xlane.xlu1 %775 }
 0x955   :  { %v778_v60 = vmul.f32 0.03125, %v776_v59  ;;  %v781_v61 = vmul.f32 %v779_v58, %v779_v58 }
 0x957   :  { %v780_v62 = vsub.f32 %v770_v54, %v778_v60  ;;  %v783_v63 = vsel %vm59_vm0, %v781_v61, 0.0 }
 0x958   :  { %784 = vadd.xlane.f32.xlu1 %v783_v63  ;;  %v1662_v63 = vld [vmem:[%s2754_s4 + $0x28] sm:$0xff] }
 0x959   :  { %v782_v0 = vmul.f32 %v780_v62, %v780_v62 }
 0x95b   :  { %v786_v1 = vsel %vm59_vm0, %v782_v0, 0.0 }
 0x95c   :  { %787 = vadd.xlane.f32.xlu1 %v786_v1  ;;  %v1663_v1 = vld [vmem:[%s2754_s4 + $0x30] sm:$0xff] }
 0x95d   :  { %v2090_v3 = vpack.c.bf16 %v1664_v2, %v1663_v1 }
 0x9e5   :  { %v785_v8 = vpop.xlane.xlu1 %784 }
 0x9e6   :  { %v789_v9 = vmul.f32 0.03125, %v785_v8 }
 0x9e8   :  { %v791_v10 = vadd.f32 1e-05, %v789_v9 }
 0x9e9   :  { %v788_v11 = vpop.xlane.xlu1 %787 }
 0x9ea   :  { %2181 = vrsqrt.f32 %v791_v10  ;;  %v790_v12 = vmul.f32 0.03125, %v788_v11 }
 0x9ec   :  { %v792_v13 = vadd.f32 1e-05, %v790_v12  ;;  %v2593_v12 = vld [vmem:[%s2758_s8 + $0x8] sm:$0x3f] }
 0x9ee   :  { %2183 = vrsqrt.f32 %v792_v13  ;;  %v1113_v13 = vrot.slane %v2593_v12, %v456_v16 }
 0x9f4   :  { %v2182_v21 = vpop.eup %2181 }
 0x9f5   :  { %v795_v24 = vmul.f32 %v2182_v21, %v779_v58 }
 0x9f7   :  { %v801_v26 = vmul.f32 %v800_v20, %v795_v24 }
 0x9f8   :  { %v2184_v27 = vpop.eup %2183 }
 0x9f9   :  { %v796_v28 = vmul.f32 %v2184_v27, %v780_v62  ;;  %v2540_v30 = vadd.f32 %v806_v25, %v801_v26  ;;  %v1661_v62 = vld [vmem:[%s2754_s4 + $0x20] sm:$0xff]  ;;  %s2233_s4 = smov 32  }
 0x9fa   :  { %v2086_v0 = vpack.c.bf16 %v1662_v63, %v1661_v62  ;;  %v1687_v63 = vld [vmem:[%s2757_s7 + $0xe0] sm:$0xff] }
 0x9fb   :  { %v802_v31 = vmul.f32 %v800_v20, %v796_v28  ;;  %1901 = vmatprep.mubr.msk.f32.mxu0 %vm59_vm0, %v2540_v30 }
 0x9fd   :  { %v2544_v32 = vadd.f32 %v806_v25, %v802_v31 }
 0x9ff   :  { %1902 = vmatmul.mubr.msk.f32.vlgmr.msra.gmra.mrb[8].mxu0 %vm59_vm0, %v2544_v32 }
 0xad2   :  { %v1903_v35 = vpop.f32.mrb[8].mxu0 }
 0xad3   :  { %v902_v17 = vadd.f32 %v1903_v35, %v1652_v33  ;;  %v896_v36 = vpop.f32.mrb[9].mxu0 }
 0xad4   :  { %v897_v37 = vadd.f32 %v1652_v33, %v896_v36 }
 0xad5   :  { %909 = vrot.lane.b32.xlu0 %v902_v17, %s2231_s18 }
 0xad6   :  { %v2076_v38 = vpack.c.bf16 %v902_v17, %v897_v37  ;;  %907 = vrot.lane.b32.xlu1 %v897_v37, %s2231_s18  ;;  %v2164_v39 = vpack.i.bf16 %v902_v17, %v897_v37 }
 0xad8   :  { %2078 = vmatprep.subr.msk.bf16.mxu0 %vm2342_vm3, %v2076_v38 }
 0xad9   :  { %2081 = vmatpush3.bf16.xpose.msk.msra.mxu0 %vm2342_vm3, %v2076_v38 }
 0xb47   :  { %v910_v41 = vpop.permute.xlu0 %909 }
 0xb48   :  { %v908_v40 = vpop.permute.xlu1 %907 }
 0xb49   :  { %1908 = vmatprep.mubr.msk.f32.mxu0 %vm59_vm0, %v908_v40  ;;  %v1668_v40 = vld [vmem:[%s2755_s5 + $0x28] sm:$0xff] }
 0xb4a   :  { %1909 = vmatmul.mubr.msk.f32.vlgmr.msra.gmra.mrb[10].mxu0 %vm59_vm0, %v910_v41 }
 0xc1d   :  { %v1910_v47 = vpop.f32.mrb[10].mxu0 }
 0xc1e   :  { %v995_v48 = vsel %vm155_vm8, %v1910_v47, -1e+30  ;;  %v985_v49 = vpop.f32.mrb[11].mxu0  ;;  %v1669_v47 = vld [vmem:[%s2755_s5 + $0x30] sm:$0xff] }
 0xc1f   :  { %v994_v29 = vsel %vm154_vm9, %v985_v49, -1e+30  ;;  %v999_v50 = vsel %vm340_vm10, %v995_v48, -inf }
 0xc20   :  { %1000 = vmax.xlane.f32.xlu0 %v999_v50  ;;  %v996_v51 = vsel %vm340_vm10, %v994_v29, -inf  ;;  %v1676_v50 = vld [vmem:[%s2757_s7 + $0x88] sm:$0xff] }
 0xc21   :  { %997 = vmax.xlane.f32.xlu1 %v996_v51  ;;  %v1677_v51 = vld [vmem:[%s2757_s7 + $0x90] sm:$0xff] }
 0xc32   :  { %2165 = vrot.lane.b32.xlu1 %v2164_v39, %s2232_s19 }
 0xcad   :  { %v1001_v42 = vpop.xlane.xlu0 %1000 }
 0xcae   :  { %v1003_v52 = vsub.f32 %v995_v48, %v1001_v42  ;;  %v998_v43 = vpop.xlane.xlu1 %997  ;;  %v1670_v48 = vld [vmem:[%s2755_s5 + $0x38] sm:$0xff] }
 0xcaf   :  { %v1002_v53 = vsub.f32 %v994_v29, %v998_v43  ;;  %v2098_v49 = vpack.c.bf16 %v1670_v48, %v1669_v47  ;;  %v1675_v29 = vld [vmem:[%s2757_s7 + $0x80] sm:$0xff] }
 0xcb0   :  { %v1006_v54 = vmul.f32 1.442695, %v1003_v52  ;;  %v2102_v42 = vpack.c.bf16 %v1676_v50, %v1675_v29  ;;  %v1678_v52 = vld [vmem:[%s2757_s7 + $0x98] sm:$0xff] }
 0xcb1   :  { %v1004_v55 = vmul.f32 1.442695, %v1002_v53  ;;  %v2106_v43 = vpack.c.bf16 %v1678_v52, %v1677_v51  ;;  %v1679_v53 = vld [vmem:[%s2757_s7 + $0xa0] sm:$0xff] }
 0xcb2   :  { %v2166_v56 = vpop.permute.xlu1 %2165  ;;  %2103 = vmatprep.subr.bf16.mxu1 %v2102_v42 }
 0xcb3   :  { %2185 = vpow2.f32 %v1004_v55  ;;  %v2168_v44 = vunpack.i.h.bf16 %v2166_v56  ;;  %v2167_v45 = vunpack.i.l.bf16 %v2166_v56  ;;  %2105 = vmatpush3.bf16.msra.mxu1 %v2102_v42  ;;  %v1681_v56 = vld [vmem:[%s2757_s7 + $0xb0] sm:$0xff] }
 0xcb4   :  { %2187 = vpow2.f32 %v1006_v54  ;;  %v1680_v54 = vld [vmem:[%s2757_s7 + $0xa8] sm:$0xff]  ;;  %2107 = vmatprep.subr.bf16.mxu1 %v2106_v43 }
 0xcb5   :  { %v2082_v57 = vpack.c.bf16 %v2168_v44, %v2167_v45  ;;  %v2110_v55 = vpack.c.bf16 %v1680_v54, %v1679_v53  ;;  %v1682_v44 = vld [vmem:[%s2757_s7 + $0xb8] sm:$0xff]  ;;  %v1475_v54 = vld [vmem:[%s2759_s9] sm:$0xff] }
 0xcb6   :  { %v2114_v45 = vpack.c.bf16 %v1682_v44, %v1681_v56  ;;  %v1477_v44 = vld [vmem:[%s2759_s9 + $0x10] sm:$0xff] }
 0xcb7   :  { %2083 = vmatprep.subr.bf16.mxu0 %v2082_v57  ;;  %2109 = vmatpush3.bf16.msra.mxu1 %v2106_v43 }
 0xcb8   :  { %2085 = vmatpush3.bf16.msra.mxu0 %v2082_v57  ;;  %2111 = vmatprep.subr.bf16.mxu1 %v2110_v55  ;;  %v1683_v57 = vld [vmem:[%s2757_s7 + $0xc0] sm:$0xff] }
 0xcb9   :  { %2087 = vmatprep.subr.bf16.mxu0 %v2086_v0 }
 0xcbb   :  { %2113 = vmatpush3.bf16.msra.mxu1 %v2110_v55  ;;  %v1476_v55 = vld [vmem:[%s2759_s9 + $0x8] sm:$0xff] }
 0xcbc   :  { %2115 = vmatprep.subr.bf16.mxu1 %v2114_v45  ;;  %v2134_v56 = vpack.c.bf16 %v1476_v55, %v1475_v54 }
 0xcbd   :  { %v2186_v58 = vpop.eup %2185 }
 0xcbe   :  { %v2188_v59 = vpop.eup %2187  ;;  %1915 = vmatprep.mubr.msk.f32.mxu0 %vm340_vm10, %v2186_v58  ;;  %v1008_v60 = vsel %vm340_vm10, %v2186_v58, 0.0  ;;  %v1684_v58 = vld [vmem:[%s2757_s7 + $0xc8] sm:$0xff] }
 0xcbf   :  { %1009 = vadd.xlane.f32.xlu0 %v1008_v60  ;;  %1916 = vmatmul.mubr.msk.f32.vlgmr.msra.gmra.mrb[12].mxu0 %vm340_vm10, %v2188_v59  ;;  %v1011_v61 = vsel %vm340_vm10, %v2188_v59, 0.0  ;;  %v2118_v59 = vpack.c.bf16 %v1684_v58, %v1683_v57  ;;  %v1685_v60 = vld [vmem:[%s2757_s7 + $0xd0] sm:$0xff]  ;;  %v1479_v58 = vld [vmem:[%s2759_s9 + $0x20] sm:$0xff] }
 0xcc0   :  { %2089 = vmatpush3.bf16.msra.mxu0 %v2086_v0  ;;  %2117 = vmatpush3.bf16.msra.mxu1 %v2114_v45  ;;  %v1688_v0 = vld [vmem:[%s2757_s7 + $0xe8] sm:$0xff]  ;;  %v1478_v45 = vld [vmem:[%s2759_s9 + $0x18] sm:$0xff] }
 0xcc1   :  { %2091 = vmatprep.subr.bf16.mxu0 %v2090_v3  ;;  %2119 = vmatprep.subr.bf16.mxu1 %v2118_v59  ;;  %v2126_v1 = vpack.c.bf16 %v1688_v0, %v1687_v63  ;;  %v2138_v57 = vpack.c.bf16 %v1478_v45, %v1477_v44 }
 0xcc3   :  { %1012 = vadd.xlane.f32.xlu0 %v1011_v61  ;;  %v1686_v61 = vld [vmem:[%s2757_s7 + $0xd8] sm:$0xff] }
 0xcc4   :  { %2093 = vmatpush3.bf16.msra.mxu0 %v2090_v3  ;;  %v2122_v62 = vpack.c.bf16 %v1686_v61, %v1685_v60  ;;  %2121 = vmatpush3.bf16.msra.mxu1 %v2118_v59  ;;  %v1480_v59 = vld [vmem:[%s2759_s9 + $0x28] sm:$0xff]  ;;  %v1481_v61 = vld [vmem:[%s2759_s9 + $0x30] sm:$0xff] }
 0xcc5   :  { %v2142_v60 = vpack.c.bf16 %v1480_v59, %v1479_v58 }
 0xcc6   :  { %2123 = vmatprep.subr.bf16.mxu1 %v2122_v62 }
 0xcc8   :  { %2125 = vmatpush3.bf16.msra.mxu1 %v2122_v62 }
 0xcc9   :  { %2127 = vmatprep.subr.bf16.mxu1 %v2126_v1 }
 0xccc   :  { %2129 = vmatpush3.bf16.msra.mxu1 %v2126_v1 }
 0xd4c   :  { %v1010_v4 = vpop.xlane.xlu0 %1009 }
 0xd4d   :  { %2189 = vrcp.f32 %v1010_v4 }
 0xd50   :  { %v1013_v5 = vpop.xlane.xlu0 %1012 }
 0xd51   :  { %2191 = vrcp.f32 %v1013_v5 }
 0xd57   :  { %v2190_v7 = vpop.eup %2189 }
 0xd5b   :  { %v2192_v9 = vpop.eup %2191 }
 0xd92   :  { %v1917_v6 = vpop.f32.mrb[12].mxu0 }
 0xd93   :  { %v1094_v8 = vpop.f32.mrb[13].mxu0  ;;  %v1104_v11 = vmul.f32 %v2192_v9, %v1917_v6 }
 0xd94   :  { %v1103_v10 = vmul.f32 %v2190_v7, %v1094_v8  ;;  %v1226_v8 = vrot.slane %v2593_v12, %v570_v14  ;;  %v1689_v14 = vld [vmem:[%s2757_s7 + $0xf0] sm:$0xff] }
 0xd96   :  { %1926 = vmatprep.mubr.msk.f32.mxu0 %vm59_vm0, %v1103_v10 }
 0xd97   :  { %1927 = vmatmul.mubr.msk.f32.vlgmr.msra.gmra.mrb[14].mxu0 %vm59_vm0, %v1104_v11  ;;  %v1232_v11 = vrot.slane %v2593_v12, %v576_v15 }
 0xe6a   :  { %v1928_v20 = vpop.f32.mrb[14].mxu0 }
 0xe6b   :  { %v1192_v21 = vadd.f32 %v1928_v20, %v1113_v13  ;;  %v1186_v24 = vpop.f32.mrb[15].mxu0 }
 0xe6c   :  { %v1187_v25 = vadd.f32 %v1186_v24, %v1113_v13 }
 0xe6d   :  { %v1196_v26 = vadd.f32 %v1192_v21, %v2544_v32 }
 0xe6e   :  { %v1195_v27 = vadd.f32 %v1187_v25, %v2540_v30 }
 0xe6f   :  { %v1200_v28 = vsel %vm59_vm0, %v1196_v26, 0.0 }
 0xe70   :  { %1201 = vadd.xlane.f32.xlu0 %v1200_v28  ;;  %v1197_v31 = vsel %vm59_vm0, %v1195_v27, 0.0  ;;  %v1672_v28 = vld [vmem:[%s2756_s6 + $0x1] ss:$0 sm:$0xff] }
 0xe71   :  { %1198 = vadd.xlane.f32.xlu1 %v1197_v31 }
 0xe82   :  { %1469 = vrot.lane.b32.xlu1 %v2329_v22, %s2233_s4  ;;  %v1667_v22 = vld [vmem:[%s2755_s5 + $0x20] sm:$0xff] }
 0xe83   :  { %v2094_v41 = vpack.c.bf16 %v1668_v40, %v1667_v22 }
 0xe85   :  { %2095 = vmatprep.subr.bf16.mxu0 %v2094_v41 }
 0xe86   :  { %2097 = vmatpush3.bf16.msra.mxu0 %v2094_v41 }
 0xe87   :  { %2099 = vmatprep.subr.bf16.mxu0 %v2098_v49 }
 0xe8a   :  { %2101 = vmatpush3.bf16.msra.mxu0 %v2098_v49 }
 0xe8b   :  { %2135 = vmatprep.subr.bf16.mxu0 %v2134_v56 }
 0xefd   :  { %v1202_v33 = vpop.xlane.xlu0 %1201 }
 0xefe   :  { %v1204_v16 = vmul.f32 0.03125, %v1202_v33  ;;  %v1199_v35 = vpop.xlane.xlu1 %1198 }
 0xeff   :  { %v1203_v17 = vmul.f32 0.03125, %v1199_v35 }
 0xf00   :  { %v2604_v36 = vsub.f32 %v1196_v26, %v1204_v16 }
 0xf01   :  { %v1205_v37 = vsub.f32 %v1195_v27, %v1203_v17  ;;  %v1690_v27 = vld [vmem:[%s2757_s7 + $0xf8] sm:$0xff] }
 0xf02   :  { %v1208_v38 = vmul.f32 %v2604_v36, %v2604_v36  ;;  %v2130_v15 = vpack.c.bf16 %v1690_v27, %v1689_v14 }
 0xf03   :  { %v1207_v32 = vmul.f32 %v1205_v37, %v1205_v37 }
 0xf04   :  { %v1212_v39 = vsel %vm59_vm0, %v1208_v38, 0.0  ;;  %2131 = vmatprep.subr.bf16.mxu1 %v2130_v15 }
 0xf05   :  { %v1209_v30 = vsel %vm59_vm0, %v1207_v32, 0.0  ;;  %2133 = vmatpush3.bf16.msra.mxu1 %v2130_v15 }
 0xf06   :  { %1210 = vadd.xlane.f32.xlu0 %v1209_v30 }
 0xf0a   :  { %1213 = vadd.xlane.f32.xlu0 %v1212_v39 }
 0xf93   :  { %v1211_v2 = vpop.xlane.xlu0 %1210 }
 0xf94   :  { %v1215_v3 = vmul.f32 0.03125, %v1211_v2 }
 0xf96   :  { %v1217_v4 = vadd.f32 1e-05, %v1215_v3 }
 0xf97   :  { %v1214_v5 = vpop.xlane.xlu0 %1213 }
 0xf98   :  { %2193 = vrsqrt.f32 %v1217_v4  ;;  %v1216_v6 = vmul.f32 0.03125, %v1214_v5  ;;  %v1458_v5 = vrot.slane %v2593_v12, %v799_v18 }
 0xf9a   :  { %v1218_v7 = vadd.f32 1e-05, %v1216_v6 }
 0xf9c   :  { %2195 = vrsqrt.f32 %v1218_v7 }
 0xfa2   :  { %v2194_v9 = vpop.eup %2193 }
 0xfa3   :  { %v1221_v10 = vmul.f32 %v2194_v9, %v1205_v37  ;;  %v1351_v37 = vrot.slane %v2593_v12, %v692_v46 }
 0xfa5   :  { %v1227_v13 = vmul.f32 %v1226_v8, %v1221_v10 }
 0xfa6   :  { %v2196_v20 = vpop.eup %2195 }
 0xfa7   :  { %v1222_v21 = vmul.f32 %v2196_v20, %v2604_v36  ;;  %v1233_v24 = vadd.f32 %v1232_v11, %v1227_v13 }
 0xfa9   :  { %v1228_v25 = vmul.f32 %v1226_v8, %v1222_v21  ;;  %1937 = vmatprep.mubr.msk.f32.mxu0 %vm59_vm0, %v1233_v24  ;;  %v1464_v8 = vrot.slane %v2593_v12, %v805_v19 }
 0xfab   :  { %v1234_v26 = vadd.f32 %v1232_v11, %v1228_v25 }
 0xfad   :  { %1938 = vmatmul.mubr.msk.f32.vlgmr.msra.gmra.mrb[16].mxu0 %vm59_vm0, %v1234_v26 }
 0xfae   :  { %2137 = vmatpush3.bf16.msra.mxu0 %v2134_v56 }
 0xfaf   :  { %2139 = vmatprep.subr.bf16.mxu0 %v2138_v57 }
 0xfb2   :  { %2141 = vmatpush3.bf16.msra.mxu0 %v2138_v57 }
 0xfb3   :  { %2143 = vmatprep.subr.bf16.mxu0 %v2142_v60 }
 0xfb6   :  { %2145 = vmatpush3.bf16.msra.mxu0 %v2142_v60 }
0x1080   :  { %v1939_v31 = vpop.f32.mrb[16].mxu0 }
0x1081   :  { %v1326_v33 = vadd.f32 %v1939_v31, %v1672_v28  ;;  %v1320_v16 = vpop.f32.mrb[17].mxu0 }
0x1082   :  { %v1321_v35 = vadd.f32 %v1672_v28, %v1320_v16 }
0x1083   :  { %v1330_v36 = vmax.f32 %v1326_v33, 0.0 }
0x1084   :  { %v1329_v17 = vmax.f32 %v1321_v35, 0.0 }
0x1086   :  { %1972 = vmatprep.mubr.f32.mxu1 %v1329_v17 }
0x1087   :  { %1973 = vmatmul.mubr.f32.vlgmr.msra.gmra.mrb[6].mxu1 %v1330_v36 }
0x115a   :  { %v1974_v32 = vpop.f32.mrb[6].mxu1 }
0x115b   :  { %v1418_v30 = vpop.f32.mrb[7].mxu1  ;;  %v1424_v38 = vadd.f32 %v1974_v32, %v1351_v37 }
0x115c   :  { %v1419_v39 = vadd.f32 %v1418_v30, %v1351_v37 }
0x115d   :  { %v1428_v41 = vadd.f32 %v1424_v38, %v1234_v26  ;;  %v1470_v26 = vpop.permute.xlu1 %1469 }
0x115e   :  { %v1427_v22 = vadd.f32 %v1419_v39, %v1233_v24 }
0x115f   :  { %v1432_v47 = vsel %vm59_vm0, %v1428_v41, 0.0 }
0x1160   :  { %v1429_v40 = vsel %vm59_vm0, %v1427_v22, 0.0 }
0x1161   :  { %1430 = vadd.xlane.f32.xlu0 %v1429_v40 }
0x1165   :  { %1433 = vadd.xlane.f32.xlu0 %v1432_v47 }
0x11ee   :  { %v1431_v48 = vpop.xlane.xlu0 %1430 }
0x11ef   :  { %v1435_v49 = vmul.f32 0.03125, %v1431_v48 }
0x11f1   :  { %v1437_v29 = vsub.f32 %v1427_v22, %v1435_v49 }
0x11f2   :  { %v1434_v50 = vpop.xlane.xlu0 %1433 }
0x11f3   :  { %v1436_v51 = vmul.f32 0.03125, %v1434_v50  ;;  %v1439_v42 = vmul.f32 %v1437_v29, %v1437_v29 }
0x11f5   :  { %v1438_v52 = vsub.f32 %v1428_v41, %v1436_v51  ;;  %v1441_v46 = vsel %vm59_vm0, %v1439_v42, 0.0  ;;  %v1695_v51 = vld [vmem:[%s2760_s10 + $0x2] ss:$0 sm:$0xff] }
0x11f6   :  { %1442 = vadd.xlane.f32.xlu0 %v1441_v46 }
0x11f7   :  { %v1440_v43 = vmul.f32 %v1438_v52, %v1438_v52 }
0x11f9   :  { %v1444_v53 = vsel %vm59_vm0, %v1440_v43, 0.0 }
0x11fa   :  { %1445 = vadd.xlane.f32.xlu0 %v1444_v53 }
0x1210   :  { %1467 = vrot.lane.b32.xlu0 %v2331_v23, %s2233_s4  ;;  %v1482_v23 = vld [vmem:[%s2759_s9 + $0x38] sm:$0xff] }
0x1211   :  { %v2146_v62 = vpack.c.bf16 %v1482_v23, %v1481_v61 }
0x1213   :  { %2147 = vmatprep.subr.bf16.mxu0 %v2146_v62 }
0x1214   :  { %2149 = vmatpush3.bf16.msra.mxu0 %v2146_v62 }
0x1283   :  { %v1443_v63 = vpop.xlane.xlu0 %1442 }
0x1284   :  { %v1447_v0 = vmul.f32 0.03125, %v1443_v63 }
0x1286   :  { %v1449_v1 = vadd.f32 1e-05, %v1447_v0 }
0x1287   :  { %v1446_v2 = vpop.xlane.xlu0 %1445 }
0x1288   :  { %2197 = vrsqrt.f32 %v1449_v1  ;;  %v1448_v3 = vmul.f32 0.03125, %v1446_v2 }
0x128a   :  { %v1450_v4 = vadd.f32 1e-05, %v1448_v3 }
0x128b   :  { %v1468_v20 = vpop.permute.xlu0 %1467 }
0x128c   :  { %2199 = vrsqrt.f32 %v1450_v4 }
0x1292   :  { %v2198_v6 = vpop.eup %2197 }
0x1293   :  { %v1453_v7 = vmul.f32 %v2198_v6, %v1437_v29  ;;  %v1694_v29 = vld [vmem:[%s2760_s10 + $0x1] ss:$0 sm:$0xff] }
0x1295   :  { %v1459_v9 = vmul.f32 %v1458_v5, %v1453_v7 }
0x1296   :  { %v2200_v10 = vpop.eup %2199 }
0x1297   :  { %v1454_v11 = vmul.f32 %v2200_v10, %v1438_v52  ;;  %v1465_v13 = vadd.f32 %v1464_v8, %v1459_v9 }
0x1299   :  { %v1473_v21 = vsel %vm59_vm0, %v1465_v13, %v1468_v20  ;;  %v1460_v24 = vmul.f32 %v1458_v5, %v1454_v11 }
0x129a   :  { %1991 = vmatprep.mubr.msk.f32.mxu0 %vm1488_vm11, %v1473_v21 }
0x129b   :  { %v1466_v25 = vadd.f32 %v1464_v8, %v1460_v24 }
0x129d   :  { %v1474_v18 = vsel %vm59_vm0, %v1466_v25, %v1470_v26 }
0x129e   :  { %1992 = vmatmul.mubr.msk.f32.vlgmr.msra.gmra.mrb[18].mxu0 %vm1488_vm11, %v1474_v18 }
0x1371   :  { %v1993_v19 = vpop.f32.mrb[18].mxu0 }
0x1372   :  { %v1567_v12 = vadd.f32 %v1993_v19, %v1691_v34  ;;  %v1561_v14 = vpop.f32.mrb[19].mxu0 }
0x1373   :  { %v1562_v27 = vadd.f32 %v1691_v34, %v1561_v14 }
0x1374   :  { %v1575_v15 = vsel %vm59_vm0, %v1567_v12, 0.0 }
0x1375   :  { %1576 = vadd.xlane.f32.xlu1 %v1575_v15  ;;  %v1572_v28 = vsel %vm59_vm0, %v1562_v27, 0.0 }
0x1376   :  { %1573 = vadd.xlane.f32.xlu0 %v1572_v28 }
0x1402   :  { %v1577_v31 = vpop.xlane.xlu1 %1576 }
0x1403   :  { %v1579_v33 = vmul.f32 0.03125, %v1577_v31  ;;  %v1574_v16 = vpop.xlane.xlu0 %1573 }
0x1404   :  { %v1578_v35 = vmul.f32 0.03125, %v1574_v16 }
0x1405   :  { %v1581_v17 = vsub.f32 %v1567_v12, %v1579_v33 }
0x1406   :  { %v1580_v36 = vsub.f32 %v1562_v27, %v1578_v35 }
0x1407   :  { %v1583_v30 = vmul.f32 %v1581_v17, %v1581_v17 }
0x1408   :  { %v1582_v37 = vmul.f32 %v1580_v36, %v1580_v36 }
0x1409   :  { %v1587_v38 = vsel %vm59_vm0, %v1583_v30, 0.0 }
0x140a   :  { %v1584_v32 = vsel %vm59_vm0, %v1582_v37, 0.0 }
0x140b   :  { %1585 = vadd.xlane.f32.xlu0 %v1584_v32 }
0x140f   :  { %1588 = vadd.xlane.f32.xlu0 %v1587_v38 }
0x1498   :  { %v1586_v39 = vpop.xlane.xlu0 %1585 }
0x1499   :  { %v1590_v22 = vmul.f32 0.03125, %v1586_v39 }
0x149b   :  { %v1592_v40 = vadd.f32 1e-05, %v1590_v22 }
0x149c   :  { %v1589_v41 = vpop.xlane.xlu0 %1588 }
0x149d   :  { %2201 = vrsqrt.f32 %v1592_v40  ;;  %v1591_v47 = vmul.f32 0.03125, %v1589_v41 }
0x149f   :  { %v1593_v48 = vadd.f32 1e-05, %v1591_v47 }
0x14a1   :  { %2203 = vrsqrt.f32 %v1593_v48 }
0x14a7   :  { %v2202_v49 = vpop.eup %2201 }
0x14a8   :  { %v1596_v50 = vmul.f32 %v2202_v49, %v1580_v36 }
0x14aa   :  { %v1602_v42 = vmul.f32 %v1694_v29, %v1596_v50 }
0x14ab   :  { %v2204_v52 = vpop.eup %2203 }
0x14ac   :  { %v1597_v46 = vmul.f32 %v2204_v52, %v1581_v17  ;;  %v1608_v43 = vadd.f32 %v1695_v51, %v1602_v42 }
0x14ae   :  { %v1603_v53 = vmul.f32 %v1694_v29, %v1597_v46  ;;  %1610 = vst.msk [vmem:[#allocation2] sm:$0xff] %vm59_vm0, %v1608_v43 }
0x14b0   :  { %v1609_v54 = vadd.f32 %v1695_v51, %v1603_v53 }
0x14b2   :  { %1611 = vst.msk [vmem:[#allocation2 + $0x8] sm:$0xff] %vm59_vm0, %v1609_v54 }
0x14b3   :  { %2216 = shalt.err (!%p2213_p4)
}
0x14b4   :  { %s2217_s3 = scalar_lea.hbm %s2761_s11, 256 }
0x14b5   :  { %p2218_p5 = scmp.ne.s32.totalorder %s2761_s11, %s2217_s3  ;;  %p2221_p6 = scmp.lt.u32.totalorder %s2217_s3, %s2761_s11 }
0x14b7   :  { %p2223_p7 = pnand %p2221_p6, %p2218_p5 }
0x14b9   :  { %2226 = shalt.err (!%p2223_p7)
}
0x14ba   :  { %s2235_s19 = smov 128   ;;  %s2236_s24 = smov 8  }
0x14bb   :  { %1623 = dma.vmem_to_hbm [thread:$0]  %s1618_s22, 256, %s2761_s11, [#allocation3], %s2235_s19, %s2235_s19, %s2236_s24  }
0x14bc   :  { %2227 = dma.done.wait [#allocation3], 256  }
0x14bd   :  { %2228 = vsyncadd [#allocation3], 4294967040 }
0x14be   :  { %1627 = vsyncpa [#allocation3], 1 }

</bundles_post_ra>
